<compile_context>
chip_gen: v7x
topology: tpu7x:2x2x1
jax: 0.10.0
libtpu: 0.0.40
codegen_flags: <defaults>
</compile_context>

<pallas_src>
import math

import jax
import jax.numpy as jnp
from jax.experimental import pallas as pl
from jax.experimental.pallas import tpu as pltpu

LANE = 128


def _round_up(x, m):
    return (x + m - 1) // m * m


def _vmem_limit_bytes():
    """Generation-aware scoped-VMEM limit (leaves double-buffering headroom)."""
    cap = 64 * 1024 * 1024  # conservative fallback = v7x per-TC VMEM
    try:
        cap = int(getattr(pltpu.get_tpu_info(), "vmem_capacity_bytes", cap))
    except Exception:
        pass
    # ~75% of physical: ~96 MiB on v5e/v6e (128 MiB), ~48 MiB on v7x (64 MiB).
    return min(int(cap * 0.75), 100 * 1024 * 1024)


def _pick_tm(n_pad, a_row_bytes, strip_budget_bytes):
    """Largest row tile that (a) divides n_pad, (b) leaves >= 2 row tiles so
    v7x's two TensorCores both get work, (c) fits the double-buffered A strip
    in the VMEM budget."""
    for tm in (512, 256, 128):
        if (n_pad % tm == 0 and n_pad // tm >= 2
                and 2 * tm * a_row_bytes <= strip_budget_bytes):
            return tm
    return min(n_pad, 128)


# ---------------- pass 1: g = relu((A_rows @ X) @ W1) @ W2 ----------------
def gcn_pass1_kernel(a_ref, x_ref, w1_ref, w2_ref, g_ref):
    a = a_ref[...].astype(jnp.bfloat16)  # in-kernel cast: no HBM copy of A
    ax = jnp.dot(a, x_ref[...], preferred_element_type=jnp.float32)
    h = jnp.dot(ax.astype(jnp.bfloat16), w1_ref[...],
                preferred_element_type=jnp.float32)
    h = jnp.maximum(h, 0.0)  # F.relu
    # TODO(synk): F.dropout(training=True) would need a pltpu.prng_* mask+scale;
    # eval-mode (identity) semantics are reproduced here.
    g = jnp.dot(h.astype(jnp.bfloat16), w2_ref[...],
                preferred_element_type=jnp.float32)
    g_ref[...] = g.astype(g_ref.dtype)


# ---------------- pass 2: out = A_rows @ g ----------------
def gcn_pass2_kernel(a_ref, g_ref, out_ref):
    a = a_ref[...].astype(jnp.bfloat16)
    out_ref[...] = jnp.dot(a, g_ref[...], preferred_element_type=jnp.float32)


def gcn_forward(x, a_norm, w1, w2):
    n, nfeat = x.shape
    nhid = w1.shape[1]
    nclass = w2.shape[1]
    assert a_norm.shape == (n, n)
    assert w1.shape == (nfeat, nhid)
    assert w2.shape == (nhid, nclass)

    n_pad = _round_up(n, LANE)
    f_pad = _round_up(nfeat, LANE)
    h_pad = _round_up(nhid, LANE)
    c_pad = _round_up(nclass, LANE)

    # A stays in its input dtype; only pad (zeros, dtype-preserving) when the
    # node count is not already lane-aligned. No cast copy in HBM.
    if n_pad != n:
        a_p = jnp.zeros((n_pad, n_pad), a_norm.dtype).at[:n, :n].set(a_norm)
    else:
        a_p = a_norm
    a_bytes = jnp.dtype(a_p.dtype).itemsize

    # Small operands: zero-pad to lane-dense shapes, cast to bf16 (MXU
    # accumulates in f32 via preferred_element_type inside the kernels).
    x_p = jnp.zeros((n_pad, f_pad), jnp.bfloat16).at[:n, :nfeat].set(
        x.astype(jnp.bfloat16))
    w1_p = jnp.zeros((f_pad, h_pad), jnp.bfloat16).at[:nfeat, :nhid].set(
        w1.astype(jnp.bfloat16))
    w2_p = jnp.zeros((h_pad, c_pad), jnp.bfloat16).at[:nhid, :nclass].set(
        w2.astype(jnp.bfloat16))

    vmem_limit = _vmem_limit_bytes()
    # VMEM-resident operands (bf16): X, W1, W2, g.
    resident_bytes = 2 * (n_pad * f_pad + f_pad * h_pad + h_pad * c_pad
                          + n_pad * c_pad)
    strip_budget = int(vmem_limit * 0.6) - resident_bytes
    tm = _pick_tm(n_pad, n_pad * a_bytes, strip_budget)
    # TODO(synk): for very large graphs (A row strip + resident X exceeding
    # VMEM) re-introduce a k-tiled contraction over A's columns.

    grid = (n_pad // tm,)
    cparams = pltpu.CompilerParams(
        dimension_semantics=("parallel",),
        vmem_limit_bytes=vmem_limit,
    )

    # ---- pass 1: g = relu((A @ X) @ W1) @ W2 ----
    cost1 = pl.CostEstimate(
        flops=(2 * n_pad * n_pad * f_pad
               + 2 * n_pad * f_pad * h_pad
               + 2 * n_pad * h_pad * c_pad),
        transcendentals=0,
        bytes_accessed=(a_bytes * n_pad * n_pad
                        + 2 * (n_pad * f_pad + f_pad * h_pad + h_pad * c_pad
                               + n_pad * c_pad)),
    )
    g = pl.pallas_call(
        gcn_pass1_kernel,
        out_shape=jax.ShapeDtypeStruct((n_pad, c_pad), jnp.bfloat16),
        grid=grid,
        in_specs=[
            pl.BlockSpec((tm, n_pad), lambda i: (i, 0)),     # A row strip
            pl.BlockSpec((n_pad, f_pad), lambda i: (0, 0)),  # X (VMEM-resident)
            pl.BlockSpec((f_pad, h_pad), lambda i: (0, 0)),  # W1 (resident)
            pl.BlockSpec((h_pad, c_pad), lambda i: (0, 0)),  # W2 (resident)
        ],
        out_specs=pl.BlockSpec((tm, c_pad), lambda i: (i, 0)),
        compiler_params=cparams,
        cost_estimate=cost1,
    )(a_p, x_p, w1_p, w2_p)

    # ---- pass 2: out = A @ g ----
    cost2 = pl.CostEstimate(
        flops=2 * n_pad * n_pad * c_pad,
        transcendentals=0,
        bytes_accessed=(a_bytes * n_pad * n_pad
                        + 2 * n_pad * c_pad + 4 * n_pad * c_pad),
    )
    out_pad = pl.pallas_call(
        gcn_pass2_kernel,
        out_shape=jax.ShapeDtypeStruct((n_pad, c_pad), jnp.float32),
        grid=grid,
        in_specs=[
            pl.BlockSpec((tm, n_pad), lambda i: (i, 0)),     # A row strip
            pl.BlockSpec((n_pad, c_pad), lambda i: (0, 0)),  # g (VMEM-resident)
        ],
        out_specs=pl.BlockSpec((tm, c_pad), lambda i: (i, 0)),
        compiler_params=cparams,
        cost_estimate=cost2,
    )(a_p, g)

    return out_pad[:n, :nclass]


def xavier_uniform(key, fan_in, fan_out):
    """Matches nn.init.xavier_uniform_ (gain=1)."""
    bound = math.sqrt(6.0 / (fan_in + fan_out))
    return jax.random.uniform(
        key, (fan_in, fan_out), dtype=jnp.float32, minval=-bound, maxval=bound
    )


def build_a_norm(key, n):
    """Symmetric normalized adjacency with self loops: D^-1/2 (A + I) D^-1/2."""
    adj = (jax.random.uniform(key, (n, n)) > 0.8).astype(jnp.float32)
    adj = jnp.maximum(adj, adj.T)  # symmetrize
    adj = adj + jnp.eye(n, dtype=jnp.float32)
    deg = jnp.sum(adj, axis=1)
    d_inv_sqrt = 1.0 / jnp.sqrt(deg)
    return adj * d_inv_sqrt[:, None] * d_inv_sqrt[None, :]


def reference_forward(x, a_norm, w1, w2):
    h = jnp.maximum(a_norm @ (x @ w1), 0.0)
    return a_norm @ (h @ w2)


if __name__ == "__main__":
    # Small graph consistent with the module: N nodes, nfeat -> nhid -> nclass.
    N, NFEAT, NHID, NCLASS = 512, 32, 64, 16

    key = jax.random.PRNGKey(0)
    k_x, k_a, k_w1, k_w2 = jax.random.split(key, 4)

    x = jax.random.normal(k_x, (N, NFEAT), dtype=jnp.float32)
    a_norm = build_a_norm(k_a, N)
    w1 = xavier_uniform(k_w1, NFEAT, NHID)
    w2 = xavier_uniform(k_w2, NHID, NCLASS)

    out = gcn_forward(x, a_norm, w1, w2)
    out = jax.block_until_ready(out)

    ref = reference_forward(x, a_norm, w1, w2)
    assert out.shape == (N, NCLASS)
    # bf16 operands with f32 accumulation -> loosened tolerance vs f32 reference
    # (deliberate precision/bandwidth trade-off).
    assert jnp.allclose(out, ref, atol=5e-2, rtol=5e-2), "mismatch vs JAX reference"

    print("KERNEL_OK")
</pallas_src>

<mosaic_0001>
module attributes {stable_mosaic.version = 11 : i64} {
  func.func @gcn_pass1_kernel(%arg0: i32, %arg1: memref<256x512xf32, #tpu.memory_space<vmem>>, %arg2: memref<512x128xbf16, #tpu.memory_space<vmem>>, %arg3: memref<128x128xbf16, #tpu.memory_space<vmem>>, %arg4: memref<128x128xbf16, #tpu.memory_space<vmem>>, %arg5: memref<256x128xbf16, #tpu.memory_space<vmem>>) attributes {dimension_semantics = [#tpu.dimension_semantics<parallel>], iteration_bounds = array<i64: 2>, scalar_prefetch = 0 : i64, scratch_operands = 0 : i64, tpu.core_type = #tpu.core_type<tc>, window_params = [{transform_indices = @transform_0, window_bounds = array<i64: 256, 512>}, {pipeline_mode = #tpu.pipeline_mode<synchronous>, transform_indices = @transform_1, window_bounds = array<i64: 512, 128>}, {pipeline_mode = #tpu.pipeline_mode<synchronous>, transform_indices = @transform_2, window_bounds = array<i64: 128, 128>}, {pipeline_mode = #tpu.pipeline_mode<synchronous>, transform_indices = @transform_3, window_bounds = array<i64: 128, 128>}, {transform_indices = @transform_4, window_bounds = array<i64: 256, 128>}]} {
    %c0 = arith.constant 0 : index
    %c0_0 = arith.constant 0 : index
    %0 = vector.load %arg1[%c0, %c0_0] : memref<256x512xf32, #tpu.memory_space<vmem>>, vector<256x512xf32>
    %1 = arith.truncf %0 : vector<256x512xf32> to vector<256x512xbf16>
    %c0_1 = arith.constant 0 : index
    %c0_2 = arith.constant 0 : index
    %2 = vector.load %arg2[%c0_1, %c0_2] : memref<512x128xbf16, #tpu.memory_space<vmem>>, vector<512x128xbf16>
    %cst = arith.constant dense<0.000000e+00> : vector<256x128xf32>
    %3 = tpu.matmul %1, %2, %cst {dimension_numbers = #tpu.dot_dimension_numbers<[1], [0], [0], [1], [0, 0, 1, 1], [], []>} : vector<256x512xbf16>, vector<512x128xbf16>, vector<256x128xf32> -> vector<256x128xf32>
    %4 = arith.truncf %3 : vector<256x128xf32> to vector<256x128xbf16>
    %c0_3 = arith.constant 0 : index
    %c0_4 = arith.constant 0 : index
    %5 = vector.load %arg3[%c0_3, %c0_4] : memref<128x128xbf16, #tpu.memory_space<vmem>>, vector<128x128xbf16>
    %cst_5 = arith.constant dense<0.000000e+00> : vector<256x128xf32>
    %6 = tpu.matmul %4, %5, %cst_5 {dimension_numbers = #tpu.dot_dimension_numbers<[1], [0], [0], [1], [0, 0, 1, 1], [], []>} : vector<256x128xbf16>, vector<128x128xbf16>, vector<256x128xf32> -> vector<256x128xf32>
    %cst_6 = arith.constant 0.000000e+00 : f32
    %7 = vector.broadcast %cst_6 : f32 to vector<256x128xf32>
    %8 = arith.maximumf %6, %7 : vector<256x128xf32>
    %9 = arith.truncf %8 : vector<256x128xf32> to vector<256x128xbf16>
    %c0_7 = arith.constant 0 : index
    %c0_8 = arith.constant 0 : index
    %10 = vector.load %arg4[%c0_7, %c0_8] : memref<128x128xbf16, #tpu.memory_space<vmem>>, vector<128x128xbf16>
    %cst_9 = arith.constant dense<0.000000e+00> : vector<256x128xf32>
    %11 = tpu.matmul %9, %10, %cst_9 {dimension_numbers = #tpu.dot_dimension_numbers<[1], [0], [0], [1], [0, 0, 1, 1], [], []>} : vector<256x128xbf16>, vector<128x128xbf16>, vector<256x128xf32> -> vector<256x128xf32>
    %12 = arith.truncf %11 : vector<256x128xf32> to vector<256x128xbf16>
    %c0_10 = arith.constant 0 : index
    %c0_11 = arith.constant 0 : index
    %13 = vector.load %arg5[%c0_10, %c0_11] : memref<256x128xbf16, #tpu.memory_space<vmem>>, vector<256x128xbf16>
    tpu.vector_store %arg5[%c0_10, %c0_11], %12 {strides = array<i32>} : memref<256x128xbf16, #tpu.memory_space<vmem>>, vector<256x128xbf16>,
    return
  }
  func.func @transform_0(%arg0: i32) -> (i32, i32) {
    %c0_i32 = arith.constant 0 : i32
    %c0_i32_0 = arith.constant 0 : i32
    return %arg0, %c0_i32 : i32, i32
  }
  func.func @transform_1(%arg0: i32) -> (i32, i32) {
    %c0_i32 = arith.constant 0 : i32
    %c0_i32_0 = arith.constant 0 : i32
    %c0_i32_1 = arith.constant 0 : i32
    return %c0_i32, %c0_i32_0 : i32, i32
  }
  func.func @transform_2(%arg0: i32) -> (i32, i32) {
    %c0_i32 = arith.constant 0 : i32
    %c0_i32_0 = arith.constant 0 : i32
    %c0_i32_1 = arith.constant 0 : i32
    return %c0_i32, %c0_i32_0 : i32, i32
  }
  func.func @transform_3(%arg0: i32) -> (i32, i32) {
    %c0_i32 = arith.constant 0 : i32
    %c0_i32_0 = arith.constant 0 : i32
    %c0_i32_1 = arith.constant 0 : i32
    return %c0_i32, %c0_i32_0 : i32, i32
  }
  func.func @transform_4(%arg0: i32) -> (i32, i32) {
    %c0_i32 = arith.constant 0 : i32
    %c0_i32_0 = arith.constant 0 : i32
    return %arg0, %c0_i32 : i32, i32
  }
}

</mosaic_0001>

<bundles_post_ra>
// kernel: tpu_custom_call.1
= control target key start
LH: loop header
LB: loop body
LE: loop exit
PB: predicated region body
PF: predicated region fallthrough
CT: control target
= control target key end

     0   :  { %9 = vsyncpa [#allocation3], 0  ;;  %s3198_s0 = inlined_call_operand.hbm [shape: f32[512,512], index: 0, kind: input, shape index: {}]   ;;  %s3199_s1 = inlined_call_operand.hbm [shape: bf16[512,128], index: 1, kind: input, shape index: {}]   ;;  %s3200_s2 = inlined_call_operand.hbm [shape: bf16[128,128], index: 2, kind: input, shape index: {}]   ;;  %s3201_s3 = inlined_call_operand.hbm [shape: bf16[128,128], index: 3, kind: input, shape index: {}]   ;;  %s3202_s4 = inlined_call_operand.hbm [shape: bf16[512,128], index: 4, kind: output, shape index: {}]  }
   0x1   :  { %11 = vsyncpa [#allocation3 + $0x1], 0 }
   0x2   :  { %12 = vsyncpa [#allocation6], 0 }
   0x3   :  { %13 = vsyncpa [#allocation9], 0 }
   0x4   :  { %14 = vsyncpa [#allocation4], 0 }
   0x5   :  { %16 = vsyncpa [#allocation4 + $0x1], 0  ;;  %s2780_s15 = smov 0   ;;  %s2782_s16 = smov 0  }
   0x6   :  { %s2784_s17 = smov 0   ;;  %s2786_s18 = smov 0  }
   0x7 LB: > { %s2801_s19 = sadd.s32 4294967295, %s2742_s18   ;;  %s1824_s20 = sadd.s32 4294967294, %s2742_s18   ;;  %s2742_s18 = sphi %s2786_s18, %s3225_s18   ;;  %s2738_s17 = sphi %s2784_s17, %s3224_s17   ;;  %s2734_s16 = sphi %s2782_s16, %s3223_s16   ;;  %s2730_s15 = sphi %s2780_s15, %s3222_s15  }
   0x8   : > { %p42_p0 = scmp.ne.s32.totalorder %s2734_s16, %s2730_s15  ;;  %p3203_p1 = scmp.eq.s32.totalorder %s2801_s19, 0 }
   0x9   : > { %p135_p3 = scmp.eq.s32.totalorder %s1824_s20, 1  ;;  %p1825_p5 = scmp.ge.s32.totalorder %s2742_s18, 1 }
   0xa   : > { %p2810_p4 = por %p3203_p1, %p42_p0  ;;  %p142_p7 = scmp.lt.s32.totalorder %s2742_s18, 3 }
   0xb   : > { %p2815_p6 = por %p135_p3, %p42_p0  ;;  %s2744_s24 = smov [#allocation5]  }
   0xc   : > { %s3206_s21 = scalar_select %p2810_p4, 1, 0 }
   0xd   : > { %s3207_s22 = scalar_select %p2815_p6, 1, 0 }
   0xe   : > { %p2820_p8 = pnand %p1825_p5, %p142_p7  ;;  %s154_s25 = sshll.u32 %s2744_s24, 4  ;;  %s2824_s25 = int_to_ptr.vmem [resolvable:$true] %s154_s25 }
   0xf   : > { %s2745_s27 = smov [#allocation7]   ;;  %s2746_s29 = smov [#allocation8]  }
  0x10   : > { %s3208_s23 = scalar_select %p2820_p8, 1, 0 }
  0x11   : > { %p2439_p9 = pneg %p2820_p8  ;;  %s167_s28 = sshll.u32 %s2745_s27, 4  ;;  %s2835_s28 = int_to_ptr.vmem [resolvable:$true] %s167_s28 }
  0x12   : > { %s2837_s30 = sshll.u32 %s2746_s29, 4  ;;  %s2554_s7 = scalar_lea.hbm %s3199_s1, 4096  ;;  %s181_s30 = int_to_ptr.vmem [resolvable:$true] %s2837_s30 }
  0x13   : > { %p2831_p11 = pnand %p2439_p9, %p3203_p1  ;;  %p2555_p12 = scmp.ne.s32.totalorder %s3199_s1, %s2554_s7 }
  0x14   : > { %p2561_p5 = scmp.lt.u32.totalorder %s2554_s7, %s3199_s1 }
  0x15   : > { %p2847_p13 = pneg %p2831_p11 }
  0x17   : > { %p2557_p0 = pnand %p2847_p13, %p2555_p12 }
  0x19   : > { %p2558_p3 = pneg %p2557_p0 }
  0x1b   : > { %p2563_p7 = pnand %p2561_p5, %p2558_p3 }
  0x1d   : > { %2566 = shalt.err (!%p2563_p7)
}
  0x1e   : > { %s2567_s13 = scalar_lea.vmem %s2824_s25, 4096  ;;  %p2575_p2 = scmp.lt.s32.totalorder %s2824_s25, %s2824_s25 }
  0x1f   : > { %p2568_p9 = scmp.ne.s32.totalorder %s2824_s25, %s2567_s13  ;;  %p2576_p6 = scmp.lt.s32.totalorder %s2567_s13, %s2567_s13 }
  0x21   : > { %p2570_p10 = pnand %p2568_p9, %p2847_p13  ;;  %p2577_p12 = por %p2576_p6, %p2575_p2 }
  0x23   : > { %p2571_p1 = pneg %p2570_p10 }
  0x25   : > { %p2578_p0 = pnand %p2577_p12, %p2571_p1 }
  0x27   : > { %2581 = shalt.err (!%p2578_p0)
}
  0x28   : > { %s2747_s14 = smov 64   ;;  %s2748_s20 = smov 4  }
  0x29   : > { %2442 = dma.hbm_to_vmem [thread:$0]  (!%p2831_p11), %s3199_s1, 4096, %s2824_s25, [#allocation6], %s2747_s14, %s2747_s14, %s2748_s20  }
  0x2a   : > { %s2582_s6 = scalar_lea.hbm %s3200_s2, 1024 }
  0x2b   : > { %p2583_p1 = scmp.ne.s32.totalorder %s3200_s2, %s2582_s6  ;;  %p2589_p10 = scmp.lt.u32.totalorder %s2582_s6, %s3200_s2 }
  0x2d   : > { %p2585_p2 = pnand %p2583_p1, %p2847_p13 }
  0x2f   : > { %p2586_p6 = pneg %p2585_p2 }
  0x31   : > { %p2591_p3 = pnand %p2589_p10, %p2586_p6 }
  0x33   : > { %2594 = shalt.err (!%p2591_p3)
}
  0x34   : > { %s2595_s25 = scalar_lea.vmem %s2835_s28, 1024  ;;  %p2603_p12 = scmp.lt.s32.totalorder %s2835_s28, %s2835_s28 }
  0x35   : > { %p2596_p5 = scmp.ne.s32.totalorder %s2835_s28, %s2595_s25  ;;  %p2604_p0 = scmp.lt.s32.totalorder %s2595_s25, %s2595_s25 }
  0x37   : > { %p2598_p7 = pnand %p2596_p5, %p2847_p13  ;;  %p2605_p1 = por %p2604_p0, %p2603_p12 }
  0x39   : > { %p2599_p9 = pneg %p2598_p7 }
  0x3b   : > { %p2606_p2 = pnand %p2605_p1, %p2599_p9 }
  0x3d   : > { %2609 = shalt.err (!%p2606_p2)
}
  0x3e   : > { %2445 = dma.hbm_to_vmem [thread:$0]  (!%p2831_p11), %s3200_s2, 1024, %s2835_s28, [#allocation6], %s2747_s14, %s2747_s14, %s2748_s20  }
  0x3f   : > { %s2610_s29 = scalar_lea.hbm %s3201_s3, 1024 }
  0x40   : > { %p2611_p6 = scmp.ne.s32.totalorder %s3201_s3, %s2610_s29  ;;  %p2617_p5 = scmp.lt.u32.totalorder %s2610_s29, %s3201_s3 }
  0x42   : > { %p2613_p10 = pnand %p2611_p6, %p2847_p13 }
  0x44   : > { %p2614_p3 = pneg %p2613_p10 }
  0x46   : > { %p2619_p7 = pnand %p2617_p5, %p2614_p3 }
  0x48   : > { %2622 = shalt.err (!%p2619_p7)
}
  0x49   : > { %s2623_s9 = scalar_lea.vmem %s181_s30, 1024  ;;  %p2631_p1 = scmp.lt.s32.totalorder %s181_s30, %s181_s30 }
  0x4a   : > { %p2624_p9 = scmp.ne.s32.totalorder %s181_s30, %s2623_s9  ;;  %p2632_p2 = scmp.lt.s32.totalorder %s2623_s9, %s2623_s9 }
  0x4c   : > { %p2626_p12 = pnand %p2624_p9, %p2847_p13  ;;  %p2633_p4 = por %p2632_p2, %p2631_p1 }
  0x4e   : > { %p2627_p0 = pneg %p2626_p12 }
  0x50   : > { %p2634_p8 = pnand %p2633_p4, %p2627_p0 }
  0x52   : > { %2637 = shalt.err (!%p2634_p8)
}
  0x53   : > { %2448 = dma.hbm_to_vmem [thread:$0]  (!%p2831_p11), %s3201_s3, 1024, %s181_s30, [#allocation9], %s2747_s14, %s2747_s14, %s2748_s20  }
  0x54   : > { %s2920_s10 = sadd.s32 1, %s2742_s18   ;;  %s29_s25 = sadd.s32 1, %s2738_s17 }
  0x55   : > { %s26_s26 = ssub.s32 %s2742_s18, %s2920_s10  ;;  %p36_p8 = scmp.ne.s32.totalorder %s2738_s17, %s2734_s16 }
  0x56   : > { %p27_p4 = scmp.eq.s32.totalorder %s26_s26, 0  ;;  %p37_p13 = scmp.eq.s32.totalorder %s2742_s18, 0 }
  0x57   : > { %p2460_p6 = scmp.lt.s32.totalorder %s2742_s18, 2  ;;  %p3211_p3 = scmp.eq.s32.totalorder %s2801_s19, 1 }
  0x58   : > { %s2930_s12 = scalar_select %p27_p4, %s2738_s17, %s29_s25  }
  0x59   : > { %p38_p10 = por %p37_p13, %p36_p8  ;;  %p2934_p5 = por %p3211_p3, %p36_p8 }
  0x5a   : > { %s194_s24 = sand.u32 1, %s2738_s17   ;;  %s1926_s27 = sshll.u32 %s2742_s18, 14 }
  0x5b   : > { %s1830_s30 = sshll.u32 %s194_s24, 10  ;;  %s2943_s29 = scalar_lea.hbm %s3198_s0, %s1926_s27 }
  0x5c   : > { %s198_s5 = scalar_lea.vmem [#allocation2], %s1830_s30  ;;  %p2945_p11 = pnand %p2460_p6, %p38_p10 }
  0x5d   : > { %s206_s6 = sshll.u32 %s198_s5, 4  ;;  %s2951_s8 = scalar_lea.sflag [#allocation3], %s194_s24  ;;  %s2949_s6 = int_to_ptr.vmem [resolvable:$true] %s206_s6 }
  0x5e   : > { %s2638_s9 = scalar_lea.hbm %s2943_s29, 16384  ;;  %p2640_p9 = pneg %p2945_p11 }
  0x5f   : > { %p2639_p7 = scmp.ne.s32.totalorder %s2943_s29, %s2638_s9  ;;  %s2643_s26 = scalar_lea.hbm %s3198_s0, 32768 }
  0x60   : > { %p2644_p1 = scmp.lt.u32.totalorder %s2943_s29, %s3198_s0  ;;  %p2645_p2 = scmp.lt.u32.totalorder %s2643_s26, %s2638_s9 }
  0x61   : > { %p2641_p12 = pnand %p2640_p9, %p2639_p7  ;;  %p2647_p8 = scmp.lt.u32.totalorder %s2638_s9, %s2943_s29 }
  0x62   : > { %p2646_p4 = por %p2645_p2, %p2644_p1 }
  0x63   : > { %p2642_p0 = pneg %p2641_p12 }
  0x64   : > { %p2648_p13 = por %p2647_p8, %p2646_p4 }
  0x66   : > { %p2649_p6 = pnand %p2648_p13, %p2642_p0 }
  0x68   : > { %2652 = shalt.err (!%p2649_p6)
}
  0x69   : > { %s2653_s24 = scalar_lea.vmem %s2949_s6, 16384  ;;  %s2749_s30 = smov [#allocation2]  }
  0x6a   : > { %p2654_p10 = scmp.ne.s32.totalorder %s2949_s6, %s2653_s24  ;;  %s2658_s14 = sshll.u32 %s2749_s30, 4  ;;  %s2659_s14 = int_to_ptr.vmem [resolvable:$false] %s2658_s14 }
  0x6b   : > { %s2660_s20 = scalar_lea.vmem %s2659_s14, 32768  ;;  %p2661_p12 = scmp.lt.s32.totalorder %s2949_s6, %s2659_s14 }
  0x6c   : > { %p2656_p3 = pnand %p2654_p10, %p2640_p9  ;;  %p2662_p1 = scmp.lt.s32.totalorder %s2660_s20, %s2653_s24 }
  0x6e   : > { %p2657_p7 = pneg %p2656_p3  ;;  %p2663_p2 = por %p2662_p1, %p2661_p12 }
  0x70   : > { %p2664_p4 = pnand %p2663_p2, %p2657_p7 }
  0x72   : > { %2667 = shalt.err (!%p2664_p4)
}
  0x73   : > { %s2750_s5 = smov 512   ;;  %s2751_s9 = smov 32  }
  0x74   : > { %2452 = dma.hbm_to_vmem [thread:$0]  (!%p2945_p11), %s2943_s29, 16384, %s2949_s6, %s2951_s8, %s2750_s5, %s2750_s5, %s2751_s9  }
  0x75   : > { %p3214_p9 = scmp.ne.s32.totalorder %s3208_s23, 0 }
  0x76   : > { %s2982_s28 = sand.u32 (!%p3214_p9), 1, %s2734_s16   ;;  %p3215_p0 = scmp.ne.s32.totalorder (!%p3214_p9), %s3206_s21, 0 }
  0x77   : > { %218 = sbr.rel (%p3214_p9) target bundleno = 962 (0x3c2), region = 36  ;;  %s1835_s11 = sshll.u32 (!%p3214_p9), %s2982_s28, 10 }
  0x78   : > { %s221_s26 = scalar_lea.sflag (!%p3214_p9), [#allocation3], %s2982_s28  ;;  %s2986_s25 = scalar_lea.vmem (!%p3214_p9), [#allocation2], %s1835_s11 }
  0x7e   : > { %2713 = dma.done.wait (%p3215_p0), %s221_s26, 16384  }
  0x7f   : > { %2715 = vsyncadd (%p3215_p0), %s221_s26, 4294950912  ;;  %p3216_p11 = scmp.eq.s32.totalorder %s2801_s19, 0 }
  0x81   : > { %2717 = dma.done.wait (%p3216_p11), [#allocation6], 5120   ;;  %p3217_p8 = pmov %p3216_p11 }
  0x83   : > { %2719 = vsyncadd (%p3217_p8), [#allocation6], 4294962176  ;;  %p3218_p13 = pmov %p3217_p8 }
  0x84   : > { %p3219_p6 = pmov %p3217_p8 }
  0x85   : > { %2721 = dma.done.wait (%p3218_p13), [#allocation9], 1024  }
  0x86   : > { %2723 = vsyncadd (%p3219_p6), [#allocation9], 4294966272  ;;  %v2506_v0 = vld [vmem:[#allocation5 + $0x40] sm:$0xff]   ;;  %v2510_v4 = vld [vmem:[#allocation5 + $0x48] sm:$0xff]   ;;  %s1839_s21 = sshll.u32 %s2982_s28, 7  ;;  %s1959_s29 = sshll.u32 %s2801_s19, 11 }
  0x87   : > { %v2507_v1 = vld [vmem:[#allocation5 + $0xc0] sm:$0xff]   ;;  %2055 = vmatprep.subr.bf16.mxu0 %v2506_v0  ;;  %v2511_v5 = vld [vmem:[#allocation5 + $0xc8] sm:$0xff]   ;;  %v2514_v8 = vld [vmem:[#allocation5 + $0x50] sm:$0xff]   ;;  %s3129_s23 = scalar_lea.vmem [#allocation10], %s1839_s21  ;;  %s3150_s27 = scalar_lea.hbm %s3202_s4, %s1959_s29 }
  0x88   : > { %v2508_v2 = vld [vmem:[#allocation5] sm:$0xff]   ;;  %2167 = vmatprep.subr.bf16.mxu1 %v2507_v1  ;;  %v2512_v6 = vld [vmem:[#allocation5 + $0x8] sm:$0xff]   ;;  %v2515_v9 = vld [vmem:[#allocation5 + $0xd0] sm:$0xff]   ;;  %s1722_s6 = sshll.u32 %s3129_s23, 4  ;;  %s1709_s24 = scalar_lea.sflag [#allocation4], %s2982_s28  ;;  %s3152_s6 = int_to_ptr.vmem [resolvable:$true] %s1722_s6 }
  0x89   : > { %v2509_v3 = vld [vmem:[#allocation5 + $0x80] sm:$0xff]   ;;  %2056 = vmatpush3.bf16.msra.mxu0 %v2508_v2  ;;  %v2513_v7 = vld [vmem:[#allocation5 + $0x88] sm:$0xff]   ;;  %v2516_v10 = vld [vmem:[#allocation5 + $0x10] sm:$0xff]   ;;  %s2668_s19 = scalar_lea.vmem %s3152_s6, 2048  ;;  %s2752_s30 = smov [#allocation10]  }
  0x8a   : > { %2168 = vmatpush3.bf16.msra.mxu1 %v2509_v3  ;;  %2057 = vmatprep.subr.bf16.mxu0 %v2510_v4  ;;  %v2517_v11 = vld [vmem:[#allocation5 + $0x90] sm:$0xff]   ;;  %v2518_v12 = vld [vmem:[#allocation5 + $0x58] sm:$0xff]   ;;  %v2522_v16 = vld [vmem:[#allocation5 + $0x60] sm:$0xff]   ;;  %p2669_p10 = scmp.ne.s32.totalorder %s3152_s6, %s2668_s19  ;;  %s2672_s14 = sshll.u32 %s2752_s30, 4  ;;  %s2673_s14 = int_to_ptr.vmem [resolvable:$false] %s2672_s14 }
  0x8b   : > { %2169 = vmatprep.subr.bf16.mxu1 %v2511_v5  ;;  %v2519_v13 = vld [vmem:[#allocation5 + $0xd8] sm:$0xff]   ;;  %v2523_v17 = vld [vmem:[#allocation5 + $0xe0] sm:$0xff]   ;;  %v2526_v20 = vld [vmem:[#allocation5 + $0x68] sm:$0xff]   ;;  %s2674_s20 = scalar_lea.vmem %s2673_s14, 4096  ;;  %p2675_p12 = scmp.lt.s32.totalorder %s3152_s6, %s2673_s14 }
  0x8c   : > { %v2520_v14 = vld [vmem:[#allocation5 + $0x18] sm:$0xff]   ;;  %v2524_v18 = vld [vmem:[#allocation5 + $0x20] sm:$0xff]   ;;  %v2527_v21 = vld [vmem:[#allocation5 + $0xe8] sm:$0xff]   ;;  %p2670_p3 = pnand %p2669_p10, %p2934_p5  ;;  %p2676_p1 = scmp.lt.s32.totalorder %s2674_s20, %s2668_s19 }
  0x8d   : > { %2058 = vmatpush3.bf16.msra.mxu0 %v2512_v6  ;;  %v2521_v15 = vld [vmem:[#allocation5 + $0x98] sm:$0xff]   ;;  %v2525_v19 = vld [vmem:[#allocation5 + $0xa0] sm:$0xff]   ;;  %v2528_v22 = vld [vmem:[#allocation5 + $0x28] sm:$0xff]  }
  0x8e   : > { %2170 = vmatpush3.bf16.msra.mxu1 %v2513_v7  ;;  %2059 = vmatprep.subr.bf16.mxu0 %v2514_v8  ;;  %v2529_v23 = vld [vmem:[#allocation5 + $0xa8] sm:$0xff]   ;;  %v2530_v24 = vld [vmem:[#allocation5 + $0x70] sm:$0xff]   ;;  %v2534_v28 = vld [vmem:[#allocation5 + $0x78] sm:$0xff]   ;;  %p2671_p7 = pneg %p2670_p3  ;;  %p2677_p2 = por %p2676_p1, %p2675_p12 }
  0x8f   : > { %2171 = vmatprep.subr.bf16.mxu1 %v2515_v9  ;;  %v2531_v25 = vld [vmem:[#allocation5 + $0xf0] sm:$0xff]   ;;  %v2535_v29 = vld [vmem:[#allocation5 + $0xf8] sm:$0xff]   ;;  %v265_v32 = vld [vmem:[%s2986_s25 + $0x8] sm:$0xff] }
  0x90   : > { %v2532_v26 = vld [vmem:[#allocation5 + $0x30] sm:$0xff]   ;;  %v2536_v30 = vld [vmem:[#allocation5 + $0x38] sm:$0xff]   ;;  %v269_v33 = vld [vmem:[%s2986_s25 + $0x28] sm:$0xff]  ;;  %p2678_p4 = pnand %p2677_p2, %p2671_p7 }
  0x91   : > { %2060 = vmatpush3.bf16.msra.mxu0 %v2516_v10  ;;  %v2533_v27 = vld [vmem:[#allocation5 + $0xb0] sm:$0xff]   ;;  %v2537_v31 = vld [vmem:[#allocation5 + $0xb8] sm:$0xff]   ;;  %v393_v35 = vpack.c.bf16 %v269_v33, %v265_v32  ;;  %v264_v37 = vld [vmem:[%s2986_s25] sm:$0xff] }
  0x92   : > { %2172 = vmatpush3.bf16.msra.mxu1 %v2517_v11  ;;  %2061 = vmatprep.subr.bf16.mxu0 %v2518_v12  ;;  %v267_v34 = vld [vmem:[%s2986_s25 + $0x18] sm:$0xff]  ;;  %v268_v38 = vld [vmem:[%s2986_s25 + $0x20] sm:$0xff]  ;;  %v266_v41 = vld [vmem:[%s2986_s25 + $0x10] sm:$0xff] }
  0x93   : > { %2173 = vmatprep.subr.bf16.mxu1 %v2519_v13  ;;  %v271_v36 = vld [vmem:[%s2986_s25 + $0x38] sm:$0xff]  ;;  %v392_v40 = vpack.c.bf16 %v268_v38, %v264_v37  ;;  %v270_v42 = vld [vmem:[%s2986_s25 + $0x30] sm:$0xff]  ;;  %v273_v43 = vld [vmem:[%s2986_s25 + $0x48] sm:$0xff]  ;;  %744 = vmatprep.mubr.bf16.mxu0 %v393_v35 }
  0x94   : > { %v395_v39 = vpack.c.bf16 %v271_v36, %v267_v34  ;;  %v394_v44 = vpack.c.bf16 %v270_v42, %v266_v41  ;;  %v277_v45 = vld [vmem:[%s2986_s25 + $0x68] sm:$0xff]  ;;  %v275_v46 = vld [vmem:[%s2986_s25 + $0x58] sm:$0xff]  ;;  %v272_v50 = vld [vmem:[%s2986_s25 + $0x40] sm:$0xff] }
  0x95   : > { %2062 = vmatpush3.bf16.msra.mxu0 %v2520_v14  ;;  %v279_v47 = vld [vmem:[%s2986_s25 + $0x78] sm:$0xff]  ;;  %v397_v48 = vpack.c.bf16 %v277_v45, %v273_v43  ;;  %v276_v51 = vld [vmem:[%s2986_s25 + $0x60] sm:$0xff]  ;;  %v274_v52 = vld [vmem:[%s2986_s25 + $0x50] sm:$0xff] }
  0x96   : > { %2174 = vmatpush3.bf16.msra.mxu1 %v2521_v15  ;;  %2063 = vmatprep.subr.bf16.mxu0 %v2522_v16  ;;  %v399_v49 = vpack.c.bf16 %v279_v47, %v275_v46  ;;  %v278_v53 = vld [vmem:[%s2986_s25 + $0x70] sm:$0xff]  ;;  %v281_v54 = vld [vmem:[%s2986_s25 + $0x88] sm:$0xff]  ;;  %v283_v56 = vld [vmem:[%s2986_s25 + $0x98] sm:$0xff]  ;;  %v396_v58 = vpack.c.bf16 %v276_v51, %v272_v50 }
  0x97   : > { %2175 = vmatprep.subr.bf16.mxu1 %v2523_v17  ;;  %905 = vmatprep.mubr.bf16.mxu1 %v395_v39  ;;  %v285_v55 = vld [vmem:[%s2986_s25 + $0xa8] sm:$0xff]  ;;  %v287_v57 = vld [vmem:[%s2986_s25 + $0xb8] sm:$0xff]  ;;  %v398_v59 = vpack.c.bf16 %v278_v53, %v274_v52  ;;  %v280_v62 = vld [vmem:[%s2986_s25 + $0x80] sm:$0xff] }
  0x98   : > { %v401_v60 = vpack.c.bf16 %v285_v55, %v281_v54  ;;  %v403_v61 = vpack.c.bf16 %v287_v57, %v283_v56  ;;  %v284_v63 = vld [vmem:[%s2986_s25 + $0xa0] sm:$0xff]  ;;  %v282_v0 = vld [vmem:[%s2986_s25 + $0x90] sm:$0xff]  ;;  %v289_v2 = vld [vmem:[%s2986_s25 + $0xc8] sm:$0xff] }
  0x99   : > { %2064 = vmatpush3.bf16.msra.mxu0 %v2524_v18  ;;  %v286_v1 = vld [vmem:[%s2986_s25 + $0xb0] sm:$0xff]  ;;  %v293_v3 = vld [vmem:[%s2986_s25 + $0xe8] sm:$0xff]  ;;  %v291_v4 = vld [vmem:[%s2986_s25 + $0xd8] sm:$0xff]  ;;  %v400_v6 = vpack.c.bf16 %v284_v63, %v280_v62 }
  0x9a   : > { %2176 = vmatpush3.bf16.msra.mxu1 %v2525_v19  ;;  %2065 = vmatprep.subr.bf16.mxu0 %v2526_v20  ;;  %v295_v5 = vld [vmem:[%s2986_s25 + $0xf8] sm:$0xff]  ;;  %v402_v7 = vpack.c.bf16 %v286_v1, %v282_v0  ;;  %v405_v8 = vpack.c.bf16 %v293_v3, %v289_v2  ;;  %v288_v10 = vld [vmem:[%s2986_s25 + $0xc0] sm:$0xff]  ;;  %v290_v12 = vld [vmem:[%s2986_s25 + $0xd0] sm:$0xff] }
  0x9b   : > { %2177 = vmatprep.subr.bf16.mxu1 %v2527_v21  ;;  %v407_v9 = vpack.c.bf16 %v295_v5, %v291_v4  ;;  %v292_v11 = vld [vmem:[%s2986_s25 + $0xe0] sm:$0xff]  ;;  %v294_v13 = vld [vmem:[%s2986_s25 + $0xf0] sm:$0xff]  ;;  %v297_v14 = vld [vmem:[%s2986_s25 + $0x108] sm:$0xff] }
  0x9c   : > { %v301_v15 = vld [vmem:[%s2986_s25 + $0x128] sm:$0xff]  ;;  %v299_v16 = vld [vmem:[%s2986_s25 + $0x118] sm:$0xff]  ;;  %v404_v18 = vpack.c.bf16 %v292_v11, %v288_v10  ;;  %v406_v19 = vpack.c.bf16 %v294_v13, %v290_v12  ;;  %v304_v34 = vld [vmem:[%s2986_s25 + $0x140] sm:$0xff] }
  0x9d   : > { %2066 = vmatpush3.bf16.msra.mxu0 %v2528_v22  ;;  %v303_v17 = vld [vmem:[%s2986_s25 + $0x138] sm:$0xff]  ;;  %v409_v20 = vpack.c.bf16 %v301_v15, %v297_v14  ;;  %v296_v22 = vld [vmem:[%s2986_s25 + $0x100] sm:$0xff]  ;;  %v306_v36 = vld [vmem:[%s2986_s25 + $0x150] sm:$0xff] }
  0x9e   : > { %2178 = vmatpush3.bf16.msra.mxu1 %v2529_v23  ;;  %2067 = vmatprep.subr.bf16.mxu0 %v2530_v24  ;;  %v411_v21 = vpack.c.bf16 %v303_v17, %v299_v16  ;;  %v300_v23 = vld [vmem:[%s2986_s25 + $0x120] sm:$0xff]  ;;  %v298_v24 = vld [vmem:[%s2986_s25 + $0x110] sm:$0xff]  ;;  %v313_v38 = vld [vmem:[%s2986_s25 + $0x188] sm:$0xff] }
  0x9f   : > { %2179 = vmatprep.subr.bf16.mxu1 %v2531_v25  ;;  %v302_v25 = vld [vmem:[%s2986_s25 + $0x130] sm:$0xff]  ;;  %v308_v35 = vld [vmem:[%s2986_s25 + $0x160] sm:$0xff]  ;;  %v317_v39 = vld [vmem:[%s2986_s25 + $0x1a8] sm:$0xff] }
  0xa0   : > { %v310_v37 = vld [vmem:[%s2986_s25 + $0x170] sm:$0xff]  ;;  %v319_v41 = vld [vmem:[%s2986_s25 + $0x1b8] sm:$0xff]  ;;  %v412_v42 = vpack.c.bf16 %v308_v35, %v304_v34  ;;  %v312_v46 = vld [vmem:[%s2986_s25 + $0x180] sm:$0xff] }
  0xa1   : > { %2068 = vmatpush3.bf16.msra.mxu0 %v2532_v26  ;;  %v305_v26 = vld [vmem:[%s2986_s25 + $0x148] sm:$0xff]  ;;  %v414_v43 = vpack.c.bf16 %v310_v37, %v306_v36  ;;  %v316_v47 = vld [vmem:[%s2986_s25 + $0x1a0] sm:$0xff]  ;;  %v318_v50 = vld [vmem:[%s2986_s25 + $0x1b0] sm:$0xff] }
  0xa2   : > { %2180 = vmatpush3.bf16.msra.mxu1 %v2533_v27  ;;  %2069 = vmatprep.subr.bf16.mxu0 %v2534_v28  ;;  %v309_v27 = vld [vmem:[%s2986_s25 + $0x168] sm:$0xff]  ;;  %v307_v28 = vld [vmem:[%s2986_s25 + $0x158] sm:$0xff]  ;;  %v2540_v56 = vld [vmem:[#allocation7 + $0x10] sm:$0xff]   ;;  %v416_v57 = vpack.c.bf16 %v316_v47, %v312_v46 }
  0xa3   : > { %2181 = vmatprep.subr.bf16.mxu1 %v2535_v29  ;;  %v311_v29 = vld [vmem:[%s2986_s25 + $0x178] sm:$0xff]  ;;  %v413_v32 = vpack.c.bf16 %v309_v27, %v305_v26  ;;  %v321_v51 = vld [vmem:[%s2986_s25 + $0x1c8] sm:$0xff]  ;;  %v320_v62 = vld [vmem:[%s2986_s25 + $0x1c0] sm:$0xff] }
  0xa4   : > { %v415_v33 = vpack.c.bf16 %v311_v29, %v307_v28  ;;  %v325_v52 = vld [vmem:[%s2986_s25 + $0x1e8] sm:$0xff]  ;;  %v323_v54 = vld [vmem:[%s2986_s25 + $0x1d8] sm:$0xff]  ;;  %v324_v63 = vld [vmem:[%s2986_s25 + $0x1e0] sm:$0xff] }
  0xa5   : > { %2070 = vmatpush3.bf16.msra.mxu0 %v2536_v30  ;;  %v408_v30 = vpack.c.bf16 %v300_v23, %v296_v22  ;;  %v2539_v53 = vld [vmem:[#allocation7 + $0x8] sm:$0xff]   ;;  %v327_v55 = vld [vmem:[%s2986_s25 + $0x1f8] sm:$0xff]  ;;  %v322_v0 = vld [vmem:[%s2986_s25 + $0x1d0] sm:$0xff] }
  0xa6   : > { %2182 = vmatpush3.bf16.msra.mxu1 %v2537_v31  ;;  %v410_v31 = vpack.c.bf16 %v302_v25, %v298_v24  ;;  %v326_v1 = vld [vmem:[%s2986_s25 + $0x1f0] sm:$0xff]  ;;  %v329_v2 = vld [vmem:[%s2986_s25 + $0x208] sm:$0xff]  ;;  %v331_v4 = vld [vmem:[%s2986_s25 + $0x218] sm:$0xff] }
  0xa7   : > { %v333_v3 = vld [vmem:[%s2986_s25 + $0x228] sm:$0xff]  ;;  %v335_v5 = vld [vmem:[%s2986_s25 + $0x238] sm:$0xff]  ;;  %v328_v10 = vld [vmem:[%s2986_s25 + $0x200] sm:$0xff] }
  0xa8   : > { %745 = vmatmul.mubr.bf16.vlgmr.msra.gmra.mrb[0].mxu0 %v392_v40  ;;  %v315_v40 = vld [vmem:[%s2986_s25 + $0x198] sm:$0xff]  ;;  %v332_v11 = vld [vmem:[%s2986_s25 + $0x220] sm:$0xff]  ;;  %v330_v12 = vld [vmem:[%s2986_s25 + $0x210] sm:$0xff] }
  0xa9   : > { %906 = vmatmul.mubr.bf16.vlgmr.msra.gmra.mrb[0].mxu1 %v394_v44  ;;  %752 = vmatprep.mubr.bf16.mxu0 %v397_v48  ;;  %v417_v44 = vpack.c.bf16 %v317_v39, %v313_v38  ;;  %v419_v45 = vpack.c.bf16 %v319_v41, %v315_v40  ;;  %v2538_v48 = vld [vmem:[#allocation7] sm:$0xff]   ;;  %v334_v13 = vld [vmem:[%s2986_s25 + $0x230] sm:$0xff]  ;;  %v337_v14 = vld [vmem:[%s2986_s25 + $0x248] sm:$0xff] }
  0xaa   : > { %913 = vmatprep.mubr.bf16.mxu1 %v399_v49  ;;  %v314_v49 = vld [vmem:[%s2986_s25 + $0x190] sm:$0xff]  ;;  %2327 = vmatprep.subr.bf16.mxu0 %v2538_v48  ;;  %v341_v15 = vld [vmem:[%s2986_s25 + $0x268] sm:$0xff]  ;;  %v339_v16 = vld [vmem:[%s2986_s25 + $0x258] sm:$0xff] }
  0xab   : > { %2328 = vmatpush3.bf16.msra.mxu0 %v2538_v48  ;;  %v343_v17 = vld [vmem:[%s2986_s25 + $0x278] sm:$0xff]  ;;  %v336_v22 = vld [vmem:[%s2986_s25 + $0x240] sm:$0xff]  ;;  %v338_v24 = vld [vmem:[%s2986_s25 + $0x250] sm:$0xff] }
  0xac   : > { %2329 = vmatprep.subr.bf16.mxu0 %v2539_v53  ;;  %v340_v23 = vld [vmem:[%s2986_s25 + $0x260] sm:$0xff]  ;;  %v342_v25 = vld [vmem:[%s2986_s25 + $0x270] sm:$0xff]  ;;  %v345_v26 = vld [vmem:[%s2986_s25 + $0x288] sm:$0xff] }
  0xad   : > { %v349_v27 = vld [vmem:[%s2986_s25 + $0x2a8] sm:$0xff]  ;;  %v347_v28 = vld [vmem:[%s2986_s25 + $0x298] sm:$0xff]  ;;  %v344_v34 = vld [vmem:[%s2986_s25 + $0x280] sm:$0xff] }
  0xae   : > { %v351_v29 = vld [vmem:[%s2986_s25 + $0x2b8] sm:$0xff]  ;;  %v348_v35 = vld [vmem:[%s2986_s25 + $0x2a0] sm:$0xff]  ;;  %v346_v36 = vld [vmem:[%s2986_s25 + $0x290] sm:$0xff] }
  0xaf   : > { %2330 = vmatpush3.bf16.msra.mxu0 %v2539_v53  ;;  %v350_v37 = vld [vmem:[%s2986_s25 + $0x2b0] sm:$0xff]  ;;  %v353_v38 = vld [vmem:[%s2986_s25 + $0x2c8] sm:$0xff]  ;;  %v355_v40 = vld [vmem:[%s2986_s25 + $0x2d8] sm:$0xff] }
  0xb0   : > { %753 = vmatmul.mubr.bf16.gmra.mrb[4].mxu0 %v396_v58  ;;  %v418_v58 = vpack.c.bf16 %v318_v50, %v314_v49  ;;  %2331 = vmatprep.subr.bf16.mxu0 %v2540_v56  ;;  %v357_v39 = vld [vmem:[%s2986_s25 + $0x2e8] sm:$0xff]  ;;  %v359_v41 = vld [vmem:[%s2986_s25 + $0x2f8] sm:$0xff]  ;;  %v352_v46 = vld [vmem:[%s2986_s25 + $0x2c0] sm:$0xff] }
  0xb1   : > { %914 = vmatmul.mubr.bf16.gmra.mrb[4].mxu1 %v398_v59  ;;  %760 = vmatprep.mubr.bf16.mxu0 %v401_v60  ;;  %v421_v59 = vpack.c.bf16 %v325_v52, %v321_v51  ;;  %v423_v60 = vpack.c.bf16 %v327_v55, %v323_v54  ;;  %v356_v47 = vld [vmem:[%s2986_s25 + $0x2e0] sm:$0xff]  ;;  %v354_v48 = vld [vmem:[%s2986_s25 + $0x2d0] sm:$0xff]  ;;  %v361_v50 = vld [vmem:[%s2986_s25 + $0x308] sm:$0xff] }
  0xb2   : > { %921 = vmatprep.mubr.bf16.mxu1 %v403_v61  ;;  %v2541_v61 = vld [vmem:[#allocation7 + $0x18] sm:$0xff]   ;;  %v358_v49 = vld [vmem:[%s2986_s25 + $0x2f0] sm:$0xff]  ;;  %v365_v51 = vld [vmem:[%s2986_s25 + $0x328] sm:$0xff]  ;;  %v436_v54 = vpack.c.bf16 %v356_v47, %v352_v46 }
  0xb3   : > { %2332 = vmatpush3.bf16.msra.mxu0 %v2540_v56  ;;  %v363_v52 = vld [vmem:[%s2986_s25 + $0x318] sm:$0xff]  ;;  %v2542_v55 = vld [vmem:[#allocation7 + $0x20] sm:$0xff]   ;;  %v438_v56 = vpack.c.bf16 %v358_v49, %v354_v48 }
  0xb4   : > { %2333 = vmatprep.subr.bf16.mxu0 %v2541_v61  ;;  %v367_v53 = vld [vmem:[%s2986_s25 + $0x338] sm:$0xff]  ;;  %v2546_v49 = vld [vmem:[#allocation8] sm:$0xff]  }
  0xb5   : > { %2375 = vmatprep.subr.bf16.mxu1 %v2546_v49 }
  0xb6   : > { %2376 = vmatpush3.bf16.msra.mxu1 %v2546_v49 }
  0xb7   : > { %2334 = vmatpush3.bf16.msra.mxu0 %v2541_v61  ;;  %v364_v61 = vld [vmem:[%s2986_s25 + $0x320] sm:$0xff] }
  0xb8   : > { %761 = vmatmul.mubr.bf16.gmra.mrb[8].mxu0 %v400_v6  ;;  %v420_v6 = vpack.c.bf16 %v324_v63, %v320_v62  ;;  %2335 = vmatprep.subr.bf16.mxu0 %v2542_v55  ;;  %v362_v62 = vld [vmem:[%s2986_s25 + $0x310] sm:$0xff] }
  0xb9   : > { %922 = vmatmul.mubr.bf16.gmra.mrb[8].mxu1 %v402_v7  ;;  %768 = vmatprep.mubr.bf16.mxu0 %v405_v8  ;;  %v422_v7 = vpack.c.bf16 %v326_v1, %v322_v0  ;;  %v425_v8 = vpack.c.bf16 %v333_v3, %v329_v2  ;;  %v366_v63 = vld [vmem:[%s2986_s25 + $0x330] sm:$0xff]  ;;  %v369_v0 = vld [vmem:[%s2986_s25 + $0x348] sm:$0xff]  ;;  %v371_v2 = vld [vmem:[%s2986_s25 + $0x358] sm:$0xff] }
  0xba   : > { %929 = vmatprep.mubr.bf16.mxu1 %v407_v9  ;;  %v427_v9 = vpack.c.bf16 %v335_v5, %v331_v4  ;;  %v373_v1 = vld [vmem:[%s2986_s25 + $0x368] sm:$0xff]  ;;  %v375_v3 = vld [vmem:[%s2986_s25 + $0x378] sm:$0xff]  ;;  %v2544_v5 = vld [vmem:[#allocation7 + $0x30] sm:$0xff]  }
  0xbb   : > { %2336 = vmatpush3.bf16.msra.mxu0 %v2542_v55 }
  0xc0   : > { %769 = vmatmul.mubr.bf16.gmra.mrb[12].mxu0 %v404_v18  ;;  %v424_v18 = vpack.c.bf16 %v332_v11, %v328_v10  ;;  %v368_v10 = vld [vmem:[%s2986_s25 + $0x340] sm:$0xff] }
  0xc1   : > { %930 = vmatmul.mubr.bf16.gmra.mrb[12].mxu1 %v406_v19  ;;  %776 = vmatprep.mubr.bf16.mxu0 %v409_v20  ;;  %v426_v19 = vpack.c.bf16 %v334_v13, %v330_v12  ;;  %v429_v20 = vpack.c.bf16 %v341_v15, %v337_v14  ;;  %v372_v11 = vld [vmem:[%s2986_s25 + $0x360] sm:$0xff]  ;;  %v370_v12 = vld [vmem:[%s2986_s25 + $0x350] sm:$0xff]  ;;  %v377_v14 = vld [vmem:[%s2986_s25 + $0x388] sm:$0xff] }
  0xc2   : > { %937 = vmatprep.mubr.bf16.mxu1 %v411_v21  ;;  %v431_v21 = vpack.c.bf16 %v343_v17, %v339_v16  ;;  %v374_v13 = vld [vmem:[%s2986_s25 + $0x370] sm:$0xff]  ;;  %v381_v15 = vld [vmem:[%s2986_s25 + $0x3a8] sm:$0xff]  ;;  %v379_v16 = vld [vmem:[%s2986_s25 + $0x398] sm:$0xff] }
  0xc3   : > { %v383_v17 = vld [vmem:[%s2986_s25 + $0x3b8] sm:$0xff] }
  0xc8   : > { %777 = vmatmul.mubr.bf16.gmra.mrb[16].mxu0 %v408_v30  ;;  %v428_v30 = vpack.c.bf16 %v340_v23, %v336_v22  ;;  %v376_v22 = vld [vmem:[%s2986_s25 + $0x380] sm:$0xff] }
  0xc9   : > { %938 = vmatmul.mubr.bf16.gmra.mrb[16].mxu1 %v410_v31  ;;  %784 = vmatprep.mubr.bf16.mxu0 %v413_v32  ;;  %v430_v31 = vpack.c.bf16 %v342_v25, %v338_v24  ;;  %v433_v32 = vpack.c.bf16 %v349_v27, %v345_v26  ;;  %v380_v23 = vld [vmem:[%s2986_s25 + $0x3a0] sm:$0xff]  ;;  %v378_v24 = vld [vmem:[%s2986_s25 + $0x390] sm:$0xff]  ;;  %v385_v26 = vld [vmem:[%s2986_s25 + $0x3c8] sm:$0xff] }
  0xca   : > { %945 = vmatprep.mubr.bf16.mxu1 %v415_v33  ;;  %v435_v33 = vpack.c.bf16 %v351_v29, %v347_v28  ;;  %v382_v25 = vld [vmem:[%s2986_s25 + $0x3b0] sm:$0xff]  ;;  %v389_v27 = vld [vmem:[%s2986_s25 + $0x3e8] sm:$0xff]  ;;  %v387_v28 = vld [vmem:[%s2986_s25 + $0x3d8] sm:$0xff] }
  0xcb   : > { %v391_v29 = vld [vmem:[%s2986_s25 + $0x3f8] sm:$0xff] }
  0xd0   : > { %785 = vmatmul.mubr.bf16.gmra.mrb[20].mxu0 %v412_v42  ;;  %v432_v42 = vpack.c.bf16 %v348_v35, %v344_v34  ;;  %v384_v34 = vld [vmem:[%s2986_s25 + $0x3c0] sm:$0xff] }
  0xd1   : > { %946 = vmatmul.mubr.bf16.gmra.mrb[20].mxu1 %v414_v43  ;;  %792 = vmatprep.mubr.bf16.mxu0 %v417_v44  ;;  %v434_v43 = vpack.c.bf16 %v350_v37, %v346_v36  ;;  %v437_v44 = vpack.c.bf16 %v357_v39, %v353_v38  ;;  %v388_v35 = vld [vmem:[%s2986_s25 + $0x3e0] sm:$0xff]  ;;  %v386_v36 = vld [vmem:[%s2986_s25 + $0x3d0] sm:$0xff] }
  0xd2   : > { %953 = vmatprep.mubr.bf16.mxu1 %v419_v45  ;;  %v439_v45 = vpack.c.bf16 %v359_v41, %v355_v40  ;;  %v390_v37 = vld [vmem:[%s2986_s25 + $0x3f0] sm:$0xff]  ;;  %v452_v38 = vpack.c.bf16 %v388_v35, %v384_v34 }
  0xd3   : > { %v454_v39 = vpack.c.bf16 %v390_v37, %v386_v36 }
  0xd8   : > { %793 = vmatmul.mubr.bf16.gmra.mrb[24].mxu0 %v416_v57  ;;  %v441_v57 = vpack.c.bf16 %v365_v51, %v361_v50  ;;  %v2547_v50 = vld [vmem:[#allocation8 + $0x8] sm:$0xff]  }
  0xd9   : > { %954 = vmatmul.mubr.bf16.gmra.mrb[24].mxu1 %v418_v58  ;;  %800 = vmatprep.mubr.bf16.mxu0 %v421_v59  ;;  %v443_v58 = vpack.c.bf16 %v367_v53, %v363_v52  ;;  %v2543_v59 = vld [vmem:[#allocation7 + $0x28] sm:$0xff]  }
  0xda   : > { %961 = vmatprep.mubr.bf16.mxu1 %v423_v60  ;;  %v360_v60 = vld [vmem:[%s2986_s25 + $0x300] sm:$0xff]  ;;  %2337 = vmatprep.subr.bf16.mxu0 %v2543_v59 }
  0xdb   : > { %2338 = vmatpush3.bf16.msra.mxu0 %v2543_v59  ;;  %v440_v4 = vpack.c.bf16 %v364_v61, %v360_v60  ;;  %2377 = vmatprep.subr.bf16.mxu1 %v2547_v50 }
  0xdc   : > { %2339 = vmatprep.subr.bf16.mxu0 %v2544_v5  ;;  %2378 = vmatpush3.bf16.msra.mxu1 %v2547_v50 }
  0xdf   : > { %2340 = vmatpush3.bf16.msra.mxu0 %v2544_v5 }
  0xe0   : > { %801 = vmatmul.mubr.bf16.gmra.mrb[28].mxu0 %v420_v6  ;;  %v442_v6 = vpack.c.bf16 %v366_v63, %v362_v62 }
  0xe1   : > { %962 = vmatmul.mubr.bf16.gmra.mrb[28].mxu1 %v422_v7  ;;  %808 = vmatprep.mubr.bf16.mxu0 %v425_v8  ;;  %v445_v7 = vpack.c.bf16 %v373_v1, %v369_v0  ;;  %v447_v8 = vpack.c.bf16 %v375_v3, %v371_v2  ;;  %v2549_v3 = vld [vmem:[#allocation8 + $0x18] sm:$0xff]  }
  0xe2   : > { %969 = vmatprep.mubr.bf16.mxu1 %v427_v9  ;;  %v2545_v9 = vld [vmem:[#allocation7 + $0x38] sm:$0xff]  }
  0xe3   : > { %2341 = vmatprep.subr.bf16.mxu0 %v2545_v9 }
  0xe4   : > { %2342 = vmatpush3.bf16.msra.mxu0 %v2545_v9  ;;  %v2550_v9 = vld [vmem:[#allocation8 + $0x20] sm:$0xff]  }
  0xe8   : > { %809 = vmatmul.mubr.bf16.gmra.mrb[32].mxu0 %v424_v18  ;;  %v444_v18 = vpack.c.bf16 %v372_v11, %v368_v10 }
  0xe9   : > { %970 = vmatmul.mubr.bf16.gmra.mrb[32].mxu1 %v426_v19  ;;  %816 = vmatprep.mubr.bf16.mxu0 %v429_v20  ;;  %v446_v19 = vpack.c.bf16 %v374_v13, %v370_v12  ;;  %v449_v20 = vpack.c.bf16 %v381_v15, %v377_v14 }
  0xea   : > { %977 = vmatprep.mubr.bf16.mxu1 %v431_v21  ;;  %v451_v21 = vpack.c.bf16 %v383_v17, %v379_v16 }
  0xf0   : > { %817 = vmatmul.mubr.bf16.gmra.mrb[36].mxu0 %v428_v30  ;;  %v448_v30 = vpack.c.bf16 %v380_v23, %v376_v22 }
  0xf1   : > { %978 = vmatmul.mubr.bf16.gmra.mrb[36].mxu1 %v430_v31  ;;  %824 = vmatprep.mubr.bf16.mxu0 %v433_v32  ;;  %v450_v31 = vpack.c.bf16 %v382_v25, %v378_v24  ;;  %v453_v32 = vpack.c.bf16 %v389_v27, %v385_v26 }
  0xf2   : > { %985 = vmatprep.mubr.bf16.mxu1 %v435_v33  ;;  %v455_v33 = vpack.c.bf16 %v391_v29, %v387_v28 }
  0xf8   : > { %825 = vmatmul.mubr.bf16.gmra.mrb[40].mxu0 %v432_v42 }
  0xf9   : > { %986 = vmatmul.mubr.bf16.gmra.mrb[40].mxu1 %v434_v43  ;;  %832 = vmatprep.mubr.bf16.mxu0 %v437_v44 }
  0xfa   : > { %993 = vmatprep.mubr.bf16.mxu1 %v439_v45 }
 0x100   : > { %833 = vmatmul.mubr.bf16.gmra.mrb[44].mxu0 %v436_v54 }
 0x101   : > { %994 = vmatmul.mubr.bf16.gmra.mrb[44].mxu1 %v438_v56  ;;  %840 = vmatprep.mubr.bf16.mxu0 %v441_v57  ;;  %v2548_v56 = vld [vmem:[#allocation8 + $0x10] sm:$0xff]  }
 0x102   : > { %1001 = vmatprep.mubr.bf16.mxu1 %v443_v58  ;;  %2379 = vmatprep.subr.bf16.mxu1 %v2548_v56 }
 0x103   : > { %2380 = vmatpush3.bf16.msra.mxu1 %v2548_v56 }
 0x104   : > { %2381 = vmatprep.subr.bf16.mxu1 %v2549_v3 }
 0x107   : > { %2382 = vmatpush3.bf16.msra.mxu1 %v2549_v3 }
 0x108   : > { %841 = vmatmul.mubr.bf16.gmra.mrb[48].mxu0 %v440_v4  ;;  %2383 = vmatprep.subr.bf16.mxu1 %v2550_v9 }
 0x109   : > { %1002 = vmatmul.mubr.bf16.gmra.mrb[48].mxu1 %v442_v6  ;;  %848 = vmatprep.mubr.bf16.mxu0 %v445_v7 }
 0x10a   : > { %1009 = vmatprep.mubr.bf16.mxu1 %v447_v8 }
 0x10b   : > { %2384 = vmatpush3.bf16.msra.mxu1 %v2550_v9 }
 0x110   : > { %849 = vmatmul.mubr.bf16.gmra.mrb[52].mxu0 %v444_v18 }
 0x111   : > { %1010 = vmatmul.mubr.bf16.gmra.mrb[52].mxu1 %v446_v19  ;;  %856 = vmatprep.mubr.bf16.mxu0 %v449_v20  ;;  %v2551_v20 = vld [vmem:[#allocation8 + $0x28] sm:$0xff]  }
 0x112   : > { %1017 = vmatprep.mubr.bf16.mxu1 %v451_v21  ;;  %2385 = vmatprep.subr.bf16.mxu1 %v2551_v20 }
 0x113   : > { %2386 = vmatpush3.bf16.msra.mxu1 %v2551_v20 }
 0x118   : > { %857 = vmatmul.mubr.bf16.gmra.mrb[56].mxu0 %v448_v30 }
 0x119   : > { %1018 = vmatmul.mubr.bf16.gmra.mrb[56].mxu1 %v450_v31  ;;  %864 = vmatprep.mubr.bf16.mxu0 %v453_v32 }
 0x11a   : > { %1025 = vmatprep.mubr.bf16.mxu1 %v455_v33 }
 0x120   : > { %865 = vmatmul.mubr.bf16.gmra.mrb[60].mxu0 %v452_v38 }
 0x121   : > { %1026 = vmatmul.mubr.bf16.gmra.mrb[60].mxu1 %v454_v39 }
 0x17b   : > { %v2071_v40 = vpop.f32.mrb[0].mxu0 }
 0x17c   : > { %v2183_v41 = vpop.f32.mrb[0].mxu1  ;;  %v2072_v42 = vpop.f32.mrb[1].mxu0 }
 0x17d   : > { %v2073_v43 = vadd.f32 %v2072_v42, %v2071_v40  ;;  %v2184_v44 = vpop.f32.mrb[1].mxu1  ;;  %v2074_v45 = vpop.f32.mrb[2].mxu0 }
 0x17e   : > { %v2185_v46 = vadd.f32 %v2184_v44, %v2183_v41  ;;  %v2186_v47 = vpop.f32.mrb[2].mxu1  ;;  %v2075_v48 = vpop.f32.mrb[3].mxu0 }
 0x17f   : > { %v2076_v51 = vadd.f32 %v2075_v48, %v2074_v45  ;;  %v2187_v52 = vpop.f32.mrb[3].mxu1 }
 0x180   : > { %v908_v53 = vadd.f32 %v2185_v46, %v2073_v43  ;;  %v2188_v54 = vadd.f32 %v2187_v52, %v2186_v47 }
 0x182   : > { %v911_v55 = vadd.f32 %v2188_v54, %v2076_v51 }
 0x183   : > { %v2077_v57 = vpop.f32.mrb[4].mxu0 }
 0x184   : > { %v2189_v58 = vpop.f32.mrb[4].mxu1  ;;  %v2078_v59 = vpop.f32.mrb[5].mxu0  ;;  %v1034_v60 = vpack.c.bf16 %v911_v55, %v908_v53 }
 0x185   : > { %v2079_v61 = vadd.f32 %v2078_v59, %v2077_v57  ;;  %v2190_v62 = vpop.f32.mrb[5].mxu1  ;;  %v2080_v63 = vpop.f32.mrb[6].mxu0 }
 0x186   : > { %v2191_v0 = vadd.f32 %v2190_v62, %v2189_v58  ;;  %v2192_v1 = vpop.f32.mrb[6].mxu1  ;;  %2343 = vmatprep.mubr.bf16.mxu0 %v1034_v60  ;;  %v2081_v2 = vpop.f32.mrb[7].mxu0 }
 0x187   : > { %v2082_v4 = vadd.f32 %v2081_v2, %v2080_v63  ;;  %v2193_v5 = vpop.f32.mrb[7].mxu1 }
 0x188   : > { %v916_v6 = vadd.f32 %v2191_v0, %v2079_v61  ;;  %v2194_v7 = vadd.f32 %v2193_v5, %v2192_v1 }
 0x18a   : > { %v919_v8 = vadd.f32 %v2194_v7, %v2082_v4 }
 0x18b   : > { %v2083_v10 = vpop.f32.mrb[8].mxu0 }
 0x18c   : > { %v1035_v11 = vpack.c.bf16 %v919_v8, %v916_v6  ;;  %v2195_v12 = vpop.f32.mrb[8].mxu1  ;;  %v2084_v13 = vpop.f32.mrb[9].mxu0 }
 0x18d   : > { %v2085_v14 = vadd.f32 %v2084_v13, %v2083_v10  ;;  %v2196_v15 = vpop.f32.mrb[9].mxu1  ;;  %v2086_v16 = vpop.f32.mrb[10].mxu0 }
 0x18e   : > { %v2197_v17 = vadd.f32 %v2196_v15, %v2195_v12  ;;  %v2198_v18 = vpop.f32.mrb[10].mxu1  ;;  %2344 = vmatmul.mubr.bf16.vlgmr.msra.gmra.mrb[64].mxu0 %v1035_v11  ;;  %v2087_v19 = vpop.f32.mrb[11].mxu0 }
 0x18f   : > { %v2088_v21 = vadd.f32 %v2087_v19, %v2086_v16  ;;  %v2199_v22 = vpop.f32.mrb[11].mxu1 }
 0x190   : > { %v924_v23 = vadd.f32 %v2197_v17, %v2085_v14  ;;  %v2200_v24 = vadd.f32 %v2199_v22, %v2198_v18 }
 0x192   : > { %v927_v25 = vadd.f32 %v2200_v24, %v2088_v21 }
 0x193   : > { %v2089_v26 = vpop.f32.mrb[12].mxu0 }
 0x194   : > { %v2201_v27 = vpop.f32.mrb[12].mxu1  ;;  %v2090_v28 = vpop.f32.mrb[13].mxu0  ;;  %v1036_v29 = vpack.c.bf16 %v927_v25, %v924_v23 }
 0x195   : > { %v2091_v30 = vadd.f32 %v2090_v28, %v2089_v26  ;;  %v2202_v31 = vpop.f32.mrb[13].mxu1  ;;  %v2092_v32 = vpop.f32.mrb[14].mxu0 }
 0x196   : > { %v2203_v33 = vadd.f32 %v2202_v31, %v2201_v27  ;;  %v2204_v34 = vpop.f32.mrb[14].mxu1  ;;  %2347 = vmatprep.mubr.bf16.mxu0 %v1036_v29  ;;  %v2093_v35 = vpop.f32.mrb[15].mxu0 }
 0x197   : > { %v2094_v36 = vadd.f32 %v2093_v35, %v2092_v32  ;;  %v2205_v37 = vpop.f32.mrb[15].mxu1 }
 0x198   : > { %v932_v38 = vadd.f32 %v2203_v33, %v2091_v30  ;;  %v2206_v39 = vadd.f32 %v2205_v37, %v2204_v34 }
 0x19a   : > { %v935_v40 = vadd.f32 %v2206_v39, %v2094_v36 }
 0x19b   : > { %v2095_v41 = vpop.f32.mrb[16].mxu0 }
 0x19c   : > { %v2207_v42 = vpop.f32.mrb[16].mxu1  ;;  %v2096_v43 = vpop.f32.mrb[17].mxu0  ;;  %v1037_v44 = vpack.c.bf16 %v935_v40, %v932_v38 }
 0x19d   : > { %v2097_v45 = vadd.f32 %v2096_v43, %v2095_v41  ;;  %v2208_v46 = vpop.f32.mrb[17].mxu1  ;;  %v2098_v47 = vpop.f32.mrb[18].mxu0 }
 0x19e   : > { %v2209_v48 = vadd.f32 %v2208_v46, %v2207_v42  ;;  %v2210_v49 = vpop.f32.mrb[18].mxu1  ;;  %2348 = vmatmul.mubr.bf16.gmra.mrb[68].mxu0 %v1037_v44  ;;  %v2099_v50 = vpop.f32.mrb[19].mxu0 }
 0x19f   : > { %v2100_v51 = vadd.f32 %v2099_v50, %v2098_v47  ;;  %v2211_v52 = vpop.f32.mrb[19].mxu1 }
 0x1a0   : > { %v940_v53 = vadd.f32 %v2209_v48, %v2097_v45  ;;  %v2212_v54 = vadd.f32 %v2211_v52, %v2210_v49 }
 0x1a2   : > { %v943_v55 = vadd.f32 %v2212_v54, %v2100_v51 }
 0x1a3   : > { %v2101_v56 = vpop.f32.mrb[20].mxu0 }
 0x1a4   : > { %v2213_v57 = vpop.f32.mrb[20].mxu1  ;;  %v2102_v58 = vpop.f32.mrb[21].mxu0  ;;  %v1038_v59 = vpack.c.bf16 %v943_v55, %v940_v53 }
 0x1a5   : > { %v2103_v60 = vadd.f32 %v2102_v58, %v2101_v56  ;;  %v2214_v61 = vpop.f32.mrb[21].mxu1  ;;  %v2104_v62 = vpop.f32.mrb[22].mxu0 }
 0x1a6   : > { %v2215_v63 = vadd.f32 %v2214_v61, %v2213_v57  ;;  %v2216_v0 = vpop.f32.mrb[22].mxu1  ;;  %2351 = vmatprep.mubr.bf16.mxu0 %v1038_v59  ;;  %v2105_v1 = vpop.f32.mrb[23].mxu0 }
 0x1a7   : > { %v2106_v2 = vadd.f32 %v2105_v1, %v2104_v62  ;;  %v2217_v3 = vpop.f32.mrb[23].mxu1 }
 0x1a8   : > { %v948_v4 = vadd.f32 %v2215_v63, %v2103_v60  ;;  %v2218_v5 = vadd.f32 %v2217_v3, %v2216_v0 }
 0x1aa   : > { %v951_v6 = vadd.f32 %v2218_v5, %v2106_v2 }
 0x1ab   : > { %v2107_v7 = vpop.f32.mrb[24].mxu0 }
 0x1ac   : > { %v2219_v8 = vpop.f32.mrb[24].mxu1  ;;  %v2108_v9 = vpop.f32.mrb[25].mxu0  ;;  %v1039_v10 = vpack.c.bf16 %v951_v6, %v948_v4 }
 0x1ad   : > { %v2109_v11 = vadd.f32 %v2108_v9, %v2107_v7  ;;  %v2220_v12 = vpop.f32.mrb[25].mxu1  ;;  %v2110_v13 = vpop.f32.mrb[26].mxu0 }
 0x1ae   : > { %v2221_v14 = vadd.f32 %v2220_v12, %v2219_v8  ;;  %v2222_v15 = vpop.f32.mrb[26].mxu1  ;;  %2352 = vmatmul.mubr.bf16.gmra.mrb[72].mxu0 %v1039_v10  ;;  %v2111_v16 = vpop.f32.mrb[27].mxu0 }
 0x1af   : > { %v2112_v17 = vadd.f32 %v2111_v16, %v2110_v13  ;;  %v2223_v18 = vpop.f32.mrb[27].mxu1 }
 0x1b0   : > { %v956_v19 = vadd.f32 %v2221_v14, %v2109_v11  ;;  %v2224_v20 = vadd.f32 %v2223_v18, %v2222_v15 }
 0x1b2   : > { %v959_v21 = vadd.f32 %v2224_v20, %v2112_v17 }
 0x1b3   : > { %v2113_v22 = vpop.f32.mrb[28].mxu0 }
 0x1b4   : > { %v2225_v23 = vpop.f32.mrb[28].mxu1  ;;  %v2114_v24 = vpop.f32.mrb[29].mxu0  ;;  %v1040_v25 = vpack.c.bf16 %v959_v21, %v956_v19 }
 0x1b5   : > { %v2115_v26 = vadd.f32 %v2114_v24, %v2113_v22  ;;  %v2226_v27 = vpop.f32.mrb[29].mxu1  ;;  %v2116_v28 = vpop.f32.mrb[30].mxu0 }
 0x1b6   : > { %v2227_v29 = vadd.f32 %v2226_v27, %v2225_v23  ;;  %v2228_v30 = vpop.f32.mrb[30].mxu1  ;;  %2355 = vmatprep.mubr.bf16.mxu0 %v1040_v25  ;;  %v2117_v31 = vpop.f32.mrb[31].mxu0 }
 0x1b7   : > { %v2118_v32 = vadd.f32 %v2117_v31, %v2116_v28  ;;  %v2229_v33 = vpop.f32.mrb[31].mxu1 }
 0x1b8   : > { %v964_v34 = vadd.f32 %v2227_v29, %v2115_v26  ;;  %v2230_v35 = vadd.f32 %v2229_v33, %v2228_v30 }
 0x1ba   : > { %v967_v36 = vadd.f32 %v2230_v35, %v2118_v32 }
 0x1bb   : > { %v2119_v37 = vpop.f32.mrb[32].mxu0 }
 0x1bc   : > { %v2231_v38 = vpop.f32.mrb[32].mxu1  ;;  %v2120_v39 = vpop.f32.mrb[33].mxu0  ;;  %v1041_v40 = vpack.c.bf16 %v967_v36, %v964_v34 }
 0x1bd   : > { %v2121_v41 = vadd.f32 %v2120_v39, %v2119_v37  ;;  %v2232_v42 = vpop.f32.mrb[33].mxu1  ;;  %v2122_v43 = vpop.f32.mrb[34].mxu0 }
 0x1be   : > { %v2233_v44 = vadd.f32 %v2232_v42, %v2231_v38  ;;  %v2234_v45 = vpop.f32.mrb[34].mxu1  ;;  %2356 = vmatmul.mubr.bf16.gmra.mrb[76].mxu0 %v1041_v40  ;;  %v2123_v46 = vpop.f32.mrb[35].mxu0 }
 0x1bf   : > { %v2124_v47 = vadd.f32 %v2123_v46, %v2122_v43  ;;  %v2235_v48 = vpop.f32.mrb[35].mxu1 }
 0x1c0   : > { %v972_v49 = vadd.f32 %v2233_v44, %v2121_v41  ;;  %v2236_v50 = vadd.f32 %v2235_v48, %v2234_v45 }
 0x1c2   : > { %v975_v51 = vadd.f32 %v2236_v50, %v2124_v47  ;;  %v2552_v47 = vld [vmem:[#allocation8 + $0x30] sm:$0xff]  }
 0x1c3   : > { %v2125_v52 = vpop.f32.mrb[36].mxu0  ;;  %2387 = vmatprep.subr.bf16.mxu1 %v2552_v47 }
 0x1c4   : > { %v2237_v53 = vpop.f32.mrb[36].mxu1  ;;  %v2126_v54 = vpop.f32.mrb[37].mxu0  ;;  %v1042_v55 = vpack.c.bf16 %v975_v51, %v972_v49  ;;  %2388 = vmatpush3.bf16.msra.mxu1 %v2552_v47 }
 0x1c5   : > { %v2127_v56 = vadd.f32 %v2126_v54, %v2125_v52  ;;  %v2238_v57 = vpop.f32.mrb[37].mxu1  ;;  %v2128_v58 = vpop.f32.mrb[38].mxu0 }
 0x1c6   : > { %v2239_v59 = vadd.f32 %v2238_v57, %v2237_v53  ;;  %v2240_v60 = vpop.f32.mrb[38].mxu1  ;;  %2359 = vmatprep.mubr.bf16.mxu0 %v1042_v55  ;;  %v2129_v61 = vpop.f32.mrb[39].mxu0  ;;  %v2553_v53 = vld [vmem:[#allocation8 + $0x38] sm:$0xff]  }
 0x1c7   : > { %v2130_v62 = vadd.f32 %v2129_v61, %v2128_v58  ;;  %v2241_v63 = vpop.f32.mrb[39].mxu1  ;;  %2389 = vmatprep.subr.bf16.mxu1 %v2553_v53 }
 0x1c8   : > { %v980_v0 = vadd.f32 %v2239_v59, %v2127_v56  ;;  %v2242_v1 = vadd.f32 %v2241_v63, %v2240_v60  ;;  %2390 = vmatpush3.bf16.msra.mxu1 %v2553_v53 }
 0x1ca   : > { %v983_v2 = vadd.f32 %v2242_v1, %v2130_v62 }
 0x1cb   : > { %v2131_v3 = vpop.f32.mrb[40].mxu0 }
 0x1cc   : > { %v2243_v4 = vpop.f32.mrb[40].mxu1  ;;  %v2132_v5 = vpop.f32.mrb[41].mxu0  ;;  %v1043_v6 = vpack.c.bf16 %v983_v2, %v980_v0 }
 0x1cd   : > { %v2133_v7 = vadd.f32 %v2132_v5, %v2131_v3  ;;  %v2244_v8 = vpop.f32.mrb[41].mxu1  ;;  %v2134_v9 = vpop.f32.mrb[42].mxu0 }
 0x1ce   : > { %v2245_v10 = vadd.f32 %v2244_v8, %v2243_v4  ;;  %v2246_v11 = vpop.f32.mrb[42].mxu1  ;;  %2360 = vmatmul.mubr.bf16.gmra.mrb[80].mxu0 %v1043_v6  ;;  %v2135_v12 = vpop.f32.mrb[43].mxu0 }
 0x1cf   : > { %v2136_v13 = vadd.f32 %v2135_v12, %v2134_v9  ;;  %v2247_v14 = vpop.f32.mrb[43].mxu1 }
 0x1d0   : > { %v988_v15 = vadd.f32 %v2245_v10, %v2133_v7  ;;  %v2248_v16 = vadd.f32 %v2247_v14, %v2246_v11 }
 0x1d2   : > { %v991_v17 = vadd.f32 %v2248_v16, %v2136_v13 }
 0x1d3   : > { %v2137_v18 = vpop.f32.mrb[44].mxu0 }
 0x1d4   : > { %v2249_v19 = vpop.f32.mrb[44].mxu1  ;;  %v2138_v20 = vpop.f32.mrb[45].mxu0  ;;  %v1044_v21 = vpack.c.bf16 %v991_v17, %v988_v15 }
 0x1d5   : > { %v2139_v22 = vadd.f32 %v2138_v20, %v2137_v18  ;;  %v2250_v23 = vpop.f32.mrb[45].mxu1  ;;  %v2140_v24 = vpop.f32.mrb[46].mxu0 }
 0x1d6   : > { %v2251_v25 = vadd.f32 %v2250_v23, %v2249_v19  ;;  %v2252_v26 = vpop.f32.mrb[46].mxu1  ;;  %2363 = vmatprep.mubr.bf16.mxu0 %v1044_v21  ;;  %v2141_v27 = vpop.f32.mrb[47].mxu0 }
 0x1d7   : > { %v2142_v28 = vadd.f32 %v2141_v27, %v2140_v24  ;;  %v2253_v29 = vpop.f32.mrb[47].mxu1 }
 0x1d8   : > { %v996_v30 = vadd.f32 %v2251_v25, %v2139_v22  ;;  %v2254_v31 = vadd.f32 %v2253_v29, %v2252_v26 }
 0x1da   : > { %v999_v32 = vadd.f32 %v2254_v31, %v2142_v28 }
 0x1db   : > { %v2143_v33 = vpop.f32.mrb[48].mxu0 }
 0x1dc   : > { %v2255_v34 = vpop.f32.mrb[48].mxu1  ;;  %v2144_v35 = vpop.f32.mrb[49].mxu0  ;;  %v1045_v36 = vpack.c.bf16 %v999_v32, %v996_v30 }
 0x1dd   : > { %v2145_v37 = vadd.f32 %v2144_v35, %v2143_v33  ;;  %v2256_v38 = vpop.f32.mrb[49].mxu1  ;;  %v2146_v39 = vpop.f32.mrb[50].mxu0 }
 0x1de   : > { %v2257_v40 = vadd.f32 %v2256_v38, %v2255_v34  ;;  %v2258_v41 = vpop.f32.mrb[50].mxu1  ;;  %2364 = vmatmul.mubr.bf16.gmra.mrb[84].mxu0 %v1045_v36  ;;  %v2147_v42 = vpop.f32.mrb[51].mxu0 }
 0x1df   : > { %v2148_v43 = vadd.f32 %v2147_v42, %v2146_v39  ;;  %v2259_v44 = vpop.f32.mrb[51].mxu1 }
 0x1e0   : > { %v1004_v45 = vadd.f32 %v2257_v40, %v2145_v37  ;;  %v2260_v46 = vadd.f32 %v2259_v44, %v2258_v41 }
 0x1e2   : > { %v1007_v48 = vadd.f32 %v2260_v46, %v2148_v43 }
 0x1e3   : > { %v2149_v49 = vpop.f32.mrb[52].mxu0 }
 0x1e4   : > { %v2261_v50 = vpop.f32.mrb[52].mxu1  ;;  %v2150_v51 = vpop.f32.mrb[53].mxu0  ;;  %v1046_v52 = vpack.c.bf16 %v1007_v48, %v1004_v45 }
 0x1e5   : > { %v2151_v54 = vadd.f32 %v2150_v51, %v2149_v49  ;;  %v2262_v55 = vpop.f32.mrb[53].mxu1  ;;  %v2152_v56 = vpop.f32.mrb[54].mxu0 }
 0x1e6   : > { %v2263_v57 = vadd.f32 %v2262_v55, %v2261_v50  ;;  %v2264_v58 = vpop.f32.mrb[54].mxu1  ;;  %2367 = vmatprep.mubr.bf16.mxu0 %v1046_v52  ;;  %v2153_v59 = vpop.f32.mrb[55].mxu0 }
 0x1e7   : > { %v2154_v60 = vadd.f32 %v2153_v59, %v2152_v56  ;;  %v2265_v61 = vpop.f32.mrb[55].mxu1 }
 0x1e8   : > { %v1012_v62 = vadd.f32 %v2263_v57, %v2151_v54  ;;  %v2266_v63 = vadd.f32 %v2265_v61, %v2264_v58 }
 0x1ea   : > { %v1015_v0 = vadd.f32 %v2266_v63, %v2154_v60 }
 0x1eb   : > { %v2155_v1 = vpop.f32.mrb[56].mxu0 }
 0x1ec   : > { %v2267_v2 = vpop.f32.mrb[56].mxu1  ;;  %v2156_v3 = vpop.f32.mrb[57].mxu0  ;;  %v1047_v4 = vpack.c.bf16 %v1015_v0, %v1012_v62 }
 0x1ed   : > { %v2157_v5 = vadd.f32 %v2156_v3, %v2155_v1  ;;  %v2268_v6 = vpop.f32.mrb[57].mxu1  ;;  %v2158_v7 = vpop.f32.mrb[58].mxu0 }
 0x1ee   : > { %v2269_v8 = vadd.f32 %v2268_v6, %v2267_v2  ;;  %v2270_v9 = vpop.f32.mrb[58].mxu1  ;;  %2368 = vmatmul.mubr.bf16.gmra.mrb[88].mxu0 %v1047_v4  ;;  %v2159_v10 = vpop.f32.mrb[59].mxu0 }
 0x1ef   : > { %v2160_v11 = vadd.f32 %v2159_v10, %v2158_v7  ;;  %v2271_v12 = vpop.f32.mrb[59].mxu1 }
 0x1f0   : > { %v1020_v13 = vadd.f32 %v2269_v8, %v2157_v5  ;;  %v2272_v14 = vadd.f32 %v2271_v12, %v2270_v9 }
 0x1f2   : > { %v1023_v15 = vadd.f32 %v2272_v14, %v2160_v11 }
 0x1f3   : > { %v2161_v16 = vpop.f32.mrb[60].mxu0 }
 0x1f4   : > { %v2273_v17 = vpop.f32.mrb[60].mxu1  ;;  %v2162_v18 = vpop.f32.mrb[61].mxu0  ;;  %v1048_v19 = vpack.c.bf16 %v1023_v15, %v1020_v13 }
 0x1f5   : > { %v2163_v20 = vadd.f32 %v2162_v18, %v2161_v16  ;;  %v2274_v21 = vpop.f32.mrb[61].mxu1  ;;  %v2164_v22 = vpop.f32.mrb[62].mxu0 }
 0x1f6   : > { %v2275_v23 = vadd.f32 %v2274_v21, %v2273_v17  ;;  %v2276_v24 = vpop.f32.mrb[62].mxu1  ;;  %2371 = vmatprep.mubr.bf16.mxu0 %v1048_v19  ;;  %v2165_v25 = vpop.f32.mrb[63].mxu0 }
 0x1f7   : > { %v2166_v26 = vadd.f32 %v2165_v25, %v2164_v22  ;;  %v2277_v27 = vpop.f32.mrb[63].mxu1 }
 0x1f8   : > { %v1028_v28 = vadd.f32 %v2275_v23, %v2163_v20  ;;  %v2278_v29 = vadd.f32 %v2277_v27, %v2276_v24 }
 0x1fa   : > { %v1031_v30 = vadd.f32 %v2278_v29, %v2166_v26 }
 0x1fc   : > { %v1049_v31 = vpack.c.bf16 %v1031_v30, %v1028_v28 }
 0x1fe   : > { %2372 = vmatmul.mubr.bf16.gmra.mrb[92].mxu0 %v1049_v31 }
 0x261   : > { %v2345_v32 = vpop.f32.mrb[64].mxu0 }
 0x262   : > { %v1148_v33 = vpop.f32.mrb[65].mxu0  ;;  %v1277_v35 = vmax.f32 %v2345_v32, 0.0 }
 0x263   : > { %v2346_v34 = vpop.f32.mrb[66].mxu0  ;;  %v1275_v38 = vmax.f32 %v1148_v33, 0.0 }
 0x264   : > { %v1278_v36 = vmax.f32 %v2346_v34, 0.0  ;;  %v1151_v37 = vpop.f32.mrb[67].mxu0 }
 0x265   : > { %v1276_v39 = vmax.f32 %v1151_v37, 0.0 }
 0x266   : > { %v1308_v40 = vpack.c.bf16 %v1278_v36, %v1277_v35 }
 0x267   : > { %v1307_v41 = vpack.c.bf16 %v1276_v39, %v1275_v38 }
 0x269   : > { %2391 = vmatprep.mubr.bf16.mxu1 %v1307_v41 }
 0x26a   : > { %2392 = vmatmul.mubr.bf16.vlgmr.msra.gmra.mrb[64].mxu1 %v1308_v40 }
 0x271   : > { %v2349_v42 = vpop.f32.mrb[68].mxu0 }
 0x272   : > { %v1164_v43 = vpop.f32.mrb[69].mxu0  ;;  %v1281_v45 = vmax.f32 %v2349_v42, 0.0 }
 0x273   : > { %v2350_v44 = vpop.f32.mrb[70].mxu0  ;;  %v1279_v48 = vmax.f32 %v1164_v43, 0.0 }
 0x274   : > { %v1282_v46 = vmax.f32 %v2350_v44, 0.0  ;;  %v1167_v47 = vpop.f32.mrb[71].mxu0 }
 0x275   : > { %v1280_v49 = vmax.f32 %v1167_v47, 0.0 }
 0x276   : > { %v1310_v50 = vpack.c.bf16 %v1282_v46, %v1281_v45 }
 0x277   : > { %v1309_v51 = vpack.c.bf16 %v1280_v49, %v1279_v48 }
 0x279   : > { %2395 = vmatprep.mubr.bf16.mxu1 %v1309_v51 }
 0x27a   : > { %2396 = vmatmul.mubr.bf16.gmra.mrb[68].mxu1 %v1310_v50 }
 0x281   : > { %v2353_v52 = vpop.f32.mrb[72].mxu0 }
 0x282   : > { %v1180_v53 = vpop.f32.mrb[73].mxu0  ;;  %v1285_v55 = vmax.f32 %v2353_v52, 0.0 }
 0x283   : > { %v2354_v54 = vpop.f32.mrb[74].mxu0  ;;  %v1283_v58 = vmax.f32 %v1180_v53, 0.0 }
 0x284   : > { %v1286_v56 = vmax.f32 %v2354_v54, 0.0  ;;  %v1183_v57 = vpop.f32.mrb[75].mxu0 }
 0x285   : > { %v1284_v59 = vmax.f32 %v1183_v57, 0.0 }
 0x286   : > { %v1312_v60 = vpack.c.bf16 %v1286_v56, %v1285_v55 }
 0x287   : > { %v1311_v61 = vpack.c.bf16 %v1284_v59, %v1283_v58 }
 0x289   : > { %2399 = vmatprep.mubr.bf16.mxu1 %v1311_v61 }
 0x28a   : > { %2400 = vmatmul.mubr.bf16.gmra.mrb[72].mxu1 %v1312_v60 }
 0x291   : > { %v2357_v62 = vpop.f32.mrb[76].mxu0 }
 0x292   : > { %v1196_v63 = vpop.f32.mrb[77].mxu0  ;;  %v1289_v1 = vmax.f32 %v2357_v62, 0.0 }
 0x293   : > { %v2358_v0 = vpop.f32.mrb[78].mxu0  ;;  %v1287_v4 = vmax.f32 %v1196_v63, 0.0 }
 0x294   : > { %v1290_v2 = vmax.f32 %v2358_v0, 0.0  ;;  %v1199_v3 = vpop.f32.mrb[79].mxu0 }
 0x295   : > { %v1288_v5 = vmax.f32 %v1199_v3, 0.0 }
 0x296   : > { %v1314_v6 = vpack.c.bf16 %v1290_v2, %v1289_v1 }
 0x297   : > { %v1313_v7 = vpack.c.bf16 %v1288_v5, %v1287_v4 }
 0x299   : > { %2403 = vmatprep.mubr.bf16.mxu1 %v1313_v7 }
 0x29a   : > { %2404 = vmatmul.mubr.bf16.gmra.mrb[76].mxu1 %v1314_v6 }
 0x2a1   : > { %v2361_v8 = vpop.f32.mrb[80].mxu0 }
 0x2a2   : > { %v1212_v9 = vpop.f32.mrb[81].mxu0  ;;  %v1293_v11 = vmax.f32 %v2361_v8, 0.0 }
 0x2a3   : > { %v2362_v10 = vpop.f32.mrb[82].mxu0  ;;  %v1291_v14 = vmax.f32 %v1212_v9, 0.0 }
 0x2a4   : > { %v1294_v12 = vmax.f32 %v2362_v10, 0.0  ;;  %v1215_v13 = vpop.f32.mrb[83].mxu0 }
 0x2a5   : > { %v1292_v15 = vmax.f32 %v1215_v13, 0.0 }
 0x2a6   : > { %v1316_v16 = vpack.c.bf16 %v1294_v12, %v1293_v11 }
 0x2a7   : > { %v1315_v17 = vpack.c.bf16 %v1292_v15, %v1291_v14 }
 0x2a9   : > { %2407 = vmatprep.mubr.bf16.mxu1 %v1315_v17 }
 0x2aa   : > { %2408 = vmatmul.mubr.bf16.gmra.mrb[80].mxu1 %v1316_v16 }
 0x2b1   : > { %v2365_v18 = vpop.f32.mrb[84].mxu0 }
 0x2b2   : > { %v1228_v19 = vpop.f32.mrb[85].mxu0  ;;  %v1297_v21 = vmax.f32 %v2365_v18, 0.0 }
 0x2b3   : > { %v2366_v20 = vpop.f32.mrb[86].mxu0  ;;  %v1295_v24 = vmax.f32 %v1228_v19, 0.0 }
 0x2b4   : > { %v1298_v22 = vmax.f32 %v2366_v20, 0.0  ;;  %v1231_v23 = vpop.f32.mrb[87].mxu0 }
 0x2b5   : > { %v1296_v25 = vmax.f32 %v1231_v23, 0.0 }
 0x2b6   : > { %v1318_v26 = vpack.c.bf16 %v1298_v22, %v1297_v21 }
 0x2b7   : > { %v1317_v27 = vpack.c.bf16 %v1296_v25, %v1295_v24 }
 0x2b9   : > { %2411 = vmatprep.mubr.bf16.mxu1 %v1317_v27 }
 0x2ba   : > { %2412 = vmatmul.mubr.bf16.gmra.mrb[84].mxu1 %v1318_v26 }
 0x2c1   : > { %v2369_v28 = vpop.f32.mrb[88].mxu0 }
 0x2c2   : > { %v1244_v29 = vpop.f32.mrb[89].mxu0  ;;  %v1301_v31 = vmax.f32 %v2369_v28, 0.0 }
 0x2c3   : > { %v2370_v30 = vpop.f32.mrb[90].mxu0  ;;  %v1299_v34 = vmax.f32 %v1244_v29, 0.0 }
 0x2c4   : > { %v1302_v32 = vmax.f32 %v2370_v30, 0.0  ;;  %v1247_v33 = vpop.f32.mrb[91].mxu0 }
 0x2c5   : > { %v1300_v35 = vmax.f32 %v1247_v33, 0.0 }
 0x2c6   : > { %v1320_v36 = vpack.c.bf16 %v1302_v32, %v1301_v31 }
 0x2c7   : > { %v1319_v37 = vpack.c.bf16 %v1300_v35, %v1299_v34 }
 0x2c9   : > { %2415 = vmatprep.mubr.bf16.mxu1 %v1319_v37 }
 0x2ca   : > { %2416 = vmatmul.mubr.bf16.gmra.mrb[88].mxu1 %v1320_v36 }
 0x2d1   : > { %v2373_v38 = vpop.f32.mrb[92].mxu0 }
 0x2d2   : > { %v1260_v39 = vpop.f32.mrb[93].mxu0  ;;  %v1305_v41 = vmax.f32 %v2373_v38, 0.0 }
 0x2d3   : > { %v2374_v40 = vpop.f32.mrb[94].mxu0  ;;  %v1303_v44 = vmax.f32 %v1260_v39, 0.0 }
 0x2d4   : > { %v1306_v42 = vmax.f32 %v2374_v40, 0.0  ;;  %v1263_v43 = vpop.f32.mrb[95].mxu0 }
 0x2d5   : > { %v1304_v45 = vmax.f32 %v1263_v43, 0.0 }
 0x2d6   : > { %v1322_v46 = vpack.c.bf16 %v1306_v42, %v1305_v41 }
 0x2d7   : > { %v1321_v47 = vpack.c.bf16 %v1304_v45, %v1303_v44 }
 0x2d9   : > { %2419 = vmatprep.mubr.bf16.mxu1 %v1321_v47 }
 0x2da   : > { %2420 = vmatmul.mubr.bf16.gmra.mrb[92].mxu1 %v1322_v46 }
 0x33d   : > { %v2393_v48 = vpop.f32.mrb[64].mxu1 }
 0x33e   : > { %v1421_v49 = vpop.f32.mrb[65].mxu1 }
 0x33f   : > { %v2394_v50 = vpop.f32.mrb[66].mxu1 }
 0x340   : > { %v1968_v51 = vpack.c.bf16 %v2394_v50, %v2393_v48  ;;  %v1424_v52 = vpop.f32.mrb[67].mxu1 }
 0x341   : > { %v1963_v53 = vpack.c.bf16 %v1424_v52, %v1421_v49 }
 0x342   : > { %2040 = vst [vmem:[%s3129_s23 + $0x8] sm:$0xff] %v1968_v51  }
 0x343   : > { %1964 = vst [vmem:[%s3129_s23] sm:$0xff] %v1963_v53  }
 0x34d   : > { %v2397_v54 = vpop.f32.mrb[68].mxu1 }
 0x34e   : > { %v1437_v55 = vpop.f32.mrb[69].mxu1 }
 0x34f   : > { %v2398_v56 = vpop.f32.mrb[70].mxu1 }
 0x350   : > { %v1978_v57 = vpack.c.bf16 %v2398_v56, %v2397_v54  ;;  %v1440_v58 = vpop.f32.mrb[71].mxu1 }
 0x351   : > { %v1973_v59 = vpack.c.bf16 %v1440_v58, %v1437_v55 }
 0x352   : > { %2042 = vst [vmem:[%s3129_s23 + $0x18] sm:$0xff] %v1978_v57  }
 0x353   : > { %2041 = vst [vmem:[%s3129_s23 + $0x10] sm:$0xff] %v1973_v59  }
 0x35d   : > { %v2401_v60 = vpop.f32.mrb[72].mxu1 }
 0x35e   : > { %v1453_v61 = vpop.f32.mrb[73].mxu1 }
 0x35f   : > { %v2402_v62 = vpop.f32.mrb[74].mxu1 }
 0x360   : > { %v1988_v63 = vpack.c.bf16 %v2402_v62, %v2401_v60  ;;  %v1456_v0 = vpop.f32.mrb[75].mxu1 }
 0x361   : > { %v1983_v1 = vpack.c.bf16 %v1456_v0, %v1453_v61 }
 0x362   : > { %2044 = vst [vmem:[%s3129_s23 + $0x28] sm:$0xff] %v1988_v63  }
 0x363   : > { %2043 = vst [vmem:[%s3129_s23 + $0x20] sm:$0xff] %v1983_v1  }
 0x36d   : > { %v2405_v2 = vpop.f32.mrb[76].mxu1 }
 0x36e   : > { %v1469_v3 = vpop.f32.mrb[77].mxu1 }
 0x36f   : > { %v2406_v4 = vpop.f32.mrb[78].mxu1 }
 0x370   : > { %v1998_v5 = vpack.c.bf16 %v2406_v4, %v2405_v2  ;;  %v1472_v6 = vpop.f32.mrb[79].mxu1 }
 0x371   : > { %v1993_v7 = vpack.c.bf16 %v1472_v6, %v1469_v3 }
 0x372   : > { %2046 = vst [vmem:[%s3129_s23 + $0x38] sm:$0xff] %v1998_v5  }
 0x373   : > { %2045 = vst [vmem:[%s3129_s23 + $0x30] sm:$0xff] %v1993_v7  }
 0x37d   : > { %v2409_v8 = vpop.f32.mrb[80].mxu1 }
 0x37e   : > { %v1485_v9 = vpop.f32.mrb[81].mxu1 }
 0x37f   : > { %v2410_v10 = vpop.f32.mrb[82].mxu1 }
 0x380   : > { %v2008_v11 = vpack.c.bf16 %v2410_v10, %v2409_v8  ;;  %v1488_v12 = vpop.f32.mrb[83].mxu1 }
 0x381   : > { %v2003_v13 = vpack.c.bf16 %v1488_v12, %v1485_v9 }
 0x382   : > { %2048 = vst [vmem:[%s3129_s23 + $0x48] sm:$0xff] %v2008_v11  }
 0x383   : > { %2047 = vst [vmem:[%s3129_s23 + $0x40] sm:$0xff] %v2003_v13  }
 0x38d   : > { %v2413_v14 = vpop.f32.mrb[84].mxu1 }
 0x38e   : > { %v1501_v15 = vpop.f32.mrb[85].mxu1 }
 0x38f   : > { %v2414_v16 = vpop.f32.mrb[86].mxu1 }
 0x390   : > { %v2018_v17 = vpack.c.bf16 %v2414_v16, %v2413_v14  ;;  %v1504_v18 = vpop.f32.mrb[87].mxu1 }
 0x391   : > { %v2013_v19 = vpack.c.bf16 %v1504_v18, %v1501_v15 }
 0x392   : > { %2050 = vst [vmem:[%s3129_s23 + $0x58] sm:$0xff] %v2018_v17  }
 0x393   : > { %2049 = vst [vmem:[%s3129_s23 + $0x50] sm:$0xff] %v2013_v19  }
 0x39d   : > { %v2417_v20 = vpop.f32.mrb[88].mxu1 }
 0x39e   : > { %v1517_v21 = vpop.f32.mrb[89].mxu1 }
 0x39f   : > { %v2418_v22 = vpop.f32.mrb[90].mxu1 }
 0x3a0   : > { %v2028_v23 = vpack.c.bf16 %v2418_v22, %v2417_v20  ;;  %v1520_v24 = vpop.f32.mrb[91].mxu1 }
 0x3a1   : > { %v2023_v25 = vpack.c.bf16 %v1520_v24, %v1517_v21 }
 0x3a2   : > { %2052 = vst [vmem:[%s3129_s23 + $0x68] sm:$0xff] %v2028_v23  }
 0x3a3   : > { %2051 = vst [vmem:[%s3129_s23 + $0x60] sm:$0xff] %v2023_v25  }
 0x3ad   : > { %v2421_v26 = vpop.f32.mrb[92].mxu1 }
 0x3ae   : > { %v1533_v27 = vpop.f32.mrb[93].mxu1 }
 0x3af   : > { %v2422_v28 = vpop.f32.mrb[94].mxu1 }
 0x3b0   : > { %v2038_v29 = vpack.c.bf16 %v2422_v28, %v2421_v26  ;;  %v1536_v30 = vpop.f32.mrb[95].mxu1 }
 0x3b1   : > { %v2033_v31 = vpack.c.bf16 %v1536_v30, %v1533_v27 }
 0x3b2   : > { %2054 = vst [vmem:[%s3129_s23 + $0x78] sm:$0xff] %v2038_v29  }
 0x3b3   : > { %2053 = vst [vmem:[%s3129_s23 + $0x70] sm:$0xff] %v2033_v31  }
 0x3b4   : > { %2681 = shalt.err (!%p2678_p4)
}
 0x3b5   : > { %s2682_s5 = scalar_lea.hbm %s3150_s27, 2048  ;;  %s2686_s26 = scalar_lea.hbm %s3202_s4, 4096 }
 0x3b6   : > { %p2683_p9 = scmp.ne.s32.totalorder %s3150_s27, %s2682_s5  ;;  %p2687_p8 = scmp.lt.u32.totalorder %s3150_s27, %s3202_s4 }
 0x3b7   : > { %p2688_p13 = scmp.lt.u32.totalorder %s2686_s26, %s2682_s5  ;;  %p2690_p10 = scmp.lt.u32.totalorder %s2682_s5, %s3150_s27 }
 0x3b8   : > { %p2684_p0 = pnand %p2683_p9, %p2934_p5 }
 0x3b9   : > { %p2689_p6 = por %p2688_p13, %p2687_p8 }
 0x3ba   : > { %p2685_p11 = pneg %p2684_p0 }
 0x3bb   : > { %p2691_p3 = por %p2690_p10, %p2689_p6 }
 0x3bd   : > { %p2692_p7 = pnand %p2691_p3, %p2685_p11 }
 0x3bf   : > { %2695 = shalt.err (!%p2692_p7)
}
 0x3c0   : > { %s2753_s23 = smov 64   ;;  %s2754_s29 = smov 4  }
 0x3c1   : > { %2437 = dma.vmem_to_hbm [thread:$0]  (%p2934_p5), %s3152_s6, 2048, %s3150_s27, %s1709_s24, %s2753_s23, %s2753_s23, %s2754_s29  }
 0x3c2 PF: > { %s1737_s7 = sand.u32 1, %s2730_s15   ;;  %p3220_p12 = scmp.ne.s32.totalorder %s3207_s22, 0 }
 0x3c3   : > { %p3221_p1 = scmp.ge.s32.totalorder %s2742_s18, 2  ;;  %s1738_s8 = scalar_lea.sflag [#allocation4], %s1737_s7 }
 0x3c5   : > { %p2454_p2 = pnand %p3221_p1, %p3220_p12 }
 0x3c7   : > { %2725 = dma.done.wait (!%p2454_p2), %s1738_s8, 2048  }
 0x3c8   : > { %2727 = vsyncadd (!%p2454_p2), %s1738_s8, 4294965248  ;;  %p19_p4 = scmp.ge.s32.totalorder %s2920_s10, 4   ;;  %s3222_s15 = smov %s2734_s16 }
 0x3c9   : > { %s3223_s16 = smov %s2738_s17  ;;  %s3224_s17 = smov %s2930_s12 }
 0x3ca   : > { %s3225_s18 = smov %s2920_s10  ;;  %21 = sbr.rel (!%p19_p4) target bundleno = 7 (0x7), region = 93 }
 0x3d1   :  { %1743 = vsyncpa [#allocation3], 1 }
 0x3d2   :  { %1745 = vsyncpa [#allocation3 + $0x1], 1 }
 0x3d3   :  { %1746 = vsyncpa [#allocation6], 1 }
 0x3d4   :  { %1747 = vsyncpa [#allocation9], 1 }
 0x3d5   :  { %1748 = vsyncpa [#allocation4], 1 }
 0x3d6   :  { %1750 = vsyncpa [#allocation4 + $0x1], 1 }

</bundles_post_ra>
